<compile_context>
chip_gen: v6e
topology: v6e:2x2x1
jax: 0.10.0
libtpu: 0.0.40
codegen_flags: <defaults>
</compile_context>

<pallas_src>
import functools

import jax
import jax.numpy as jnp
from jax.experimental import pallas as pl
from jax.experimental.pallas import tpu as pltpu

# Layer sizes from the PyTorch module, and their lane-padded counterparts.
DIMS = [1000, 600, 200, 86, 16, 7]
PDIMS = [1000, 640, 256, 128, 128, 128]   # 1000 stays (K dim of layer 1; full-array block)
OUT_PAD = PDIMS[-1]
DEFAULT_TB = 1024      # batch tile: amortizes per-step overhead; sweep 512-2048 if desired


def _round_up(n, m):
    return ((n + m - 1) // m) * m


def mlp_kernel(x_ref,
               w1_ref, b1_ref,
               w2_ref, b2_ref,
               w3_ref, b3_ref,
               w4_ref, b4_ref,
               w5_ref, b5_ref,
               o_ref):
    """One batch tile of the MLP forward. Weights stay resident in VMEM across grid steps.

    x and weights arrive in bf16 (MXU-native, halves DMA); accumulation is f32
    (preferred_element_type); bias-add / ReLU run in f32 (native VPU on v5e).
    """
    # TODO(synk): training-mode dropout (p=0.5) not implemented; eval-mode identity used.
    h = jnp.dot(x_ref[...], w1_ref[...], preferred_element_type=jnp.float32) + b1_ref[...]
    h = jnp.maximum(h, 0.0)

    h = jnp.dot(h.astype(jnp.bfloat16), w2_ref[...],
                preferred_element_type=jnp.float32) + b2_ref[...]
    h = jnp.maximum(h, 0.0)

    h = jnp.dot(h.astype(jnp.bfloat16), w3_ref[...],
                preferred_element_type=jnp.float32) + b3_ref[...]
    h = jnp.maximum(h, 0.0)

    h = jnp.dot(h.astype(jnp.bfloat16), w4_ref[...],
                preferred_element_type=jnp.float32) + b4_ref[...]
    h = jnp.maximum(h, 0.0)

    h = jnp.dot(h.astype(jnp.bfloat16), w5_ref[...],
                preferred_element_type=jnp.float32) + b5_ref[...]
    o_ref[...] = h.astype(o_ref.dtype)


@functools.partial(jax.jit, static_argnames=("tb",))
def mlp_forward(x, params, tb=DEFAULT_TB):
    """x: (B, 1000) f32.  params: list of (W_bf16 (pin, pout), b_f32 (1, pout)), lane-padded."""
    B = x.shape[0]

    # Tile selection: no bigger than the (16-rounded) batch; on large batches ensure >=2 grid
    # steps so the 'parallel' axis can be sharded across v7x's two TensorCores.
    tb = min(tb, _round_up(B, 16))
    if B >= 1024 and _round_up(B, tb) == tb:
        tb = _round_up(tb // 2, 16)
    b_pad = _round_up(B, tb)

    # Ship x as bf16: halves the dominant input DMA; the kernel fed the MXU bf16 anyway.
    x = x.astype(jnp.bfloat16)
    if b_pad != B:
        x = jnp.pad(x, ((0, b_pad - B), (0, 0)))

    flat = [x]
    param_specs = []
    for w, b in params:
        flat += [w, b]
        # Constant block index => weights/biases resident in VMEM across the batch grid.
        param_specs.append(pl.BlockSpec(w.shape, lambda i: (0, 0)))
        param_specs.append(pl.BlockSpec(b.shape, lambda i: (0, 0)))

    out = pl.pallas_call(
        mlp_kernel,
        out_shape=jax.ShapeDtypeStruct((b_pad, OUT_PAD), jnp.float32),
        grid=(b_pad // tb,),
        in_specs=[pl.BlockSpec((tb, PDIMS[0]), lambda i: (i, 0))] + param_specs,
        out_specs=pl.BlockSpec((tb, OUT_PAD), lambda i: (i, 0)),
        compiler_params=pltpu.CompilerParams(
            dimension_semantics=("parallel",),         # v7x: shard batch tiles across both TCs
            vmem_limit_bytes=48 * 1024 * 1024,         # TB=1024 bf16 fits; covers v5e's 16MiB default
        ),
    )(*flat)
    return out[:B, :DIMS[-1]]


def init_params(key):
    """Deterministic init mimicking torch.nn.Linear default (uniform +-1/sqrt(fan_in)).

    Weights are (in_features, out_features) so the kernel computes x @ W, stored in bf16 and
    zero-padded to lane-friendly widths (PDIMS). Biases are (1, out_pad) f32, zero-padded.
    Zero pad rows/cols + zero bias + ReLU(0)=0 make the padding mathematically exact.
    """
    params = []
    n_layers = len(DIMS) - 1
    for i in range(n_layers):
        fan_in, fan_out = DIMS[i], DIMS[i + 1]
        pin, pout = PDIMS[i], PDIMS[i + 1]
        key, kw, kb = jax.random.split(key, 3)
        bound = 1.0 / jnp.sqrt(float(fan_in))
        w = jax.random.uniform(kw, (fan_in, fan_out), jnp.float32, -bound, bound)
        b = jax.random.uniform(kb, (1, fan_out), jnp.float32, -bound, bound)
        w = jnp.pad(w, ((0, pin - fan_in), (0, pout - fan_out)))
        b = jnp.pad(b, ((0, 0), (0, pout - fan_out)))
        params.append((w.astype(jnp.bfloat16), b))
    return params


def mlp_reference(x, params):
    """Pure-JAX reference with the same bf16-in / f32-accumulate math as the kernel."""
    h = x.astype(jnp.bfloat16).astype(jnp.float32)
    for i, (w, b) in enumerate(params):
        h = h @ w.astype(jnp.float32) + b
        if i < len(params) - 1:
            h = jnp.maximum(h, 0.0)
            h = h.astype(jnp.bfloat16).astype(jnp.float32)
    return h[:, :DIMS[-1]]


if __name__ == "__main__":
    key = jax.random.PRNGKey(0)
    key, kx = jax.random.split(key)

    B = 8
    x = jax.random.normal(kx, (B, DIMS[0]), jnp.float32)
    params = init_params(key)

    out = mlp_forward(x, params)
    out = jax.block_until_ready(out)

    ref = mlp_reference(x, params)
    assert out.shape == (B, DIMS[-1]), out.shape
    assert jnp.allclose(out, ref, atol=2e-2, rtol=2e-2), "mismatch vs reference"

    print("KERNEL_OK")
</pallas_src>

<mosaic_0001>
module attributes {stable_mosaic.version = 11 : i64} {
  func.func @mlp_kernel(%arg0: i32, %arg1: memref<16x1000xbf16, #tpu.memory_space<vmem>>, %arg2: memref<1000x640xbf16, #tpu.memory_space<vmem>>, %arg3: memref<1x640xf32, #tpu.memory_space<vmem>>, %arg4: memref<640x256xbf16, #tpu.memory_space<vmem>>, %arg5: memref<1x256xf32, #tpu.memory_space<vmem>>, %arg6: memref<256x128xbf16, #tpu.memory_space<vmem>>, %arg7: memref<1x128xf32, #tpu.memory_space<vmem>>, %arg8: memref<128x128xbf16, #tpu.memory_space<vmem>>, %arg9: memref<1x128xf32, #tpu.memory_space<vmem>>, %arg10: memref<128x128xbf16, #tpu.memory_space<vmem>>, %arg11: memref<1x128xf32, #tpu.memory_space<vmem>>, %arg12: memref<16x128xf32, #tpu.memory_space<vmem>>) attributes {dimension_semantics = [#tpu.dimension_semantics<parallel>], iteration_bounds = array<i64: 1>, scalar_prefetch = 0 : i64, scratch_operands = 0 : i64, tpu.core_type = #tpu.core_type<tc>, window_params = [{transform_indices = @transform_0, window_bounds = array<i64: 16, 1000>}, {pipeline_mode = #tpu.pipeline_mode<synchronous>, transform_indices = @transform_1, window_bounds = array<i64: 1000, 640>}, {pipeline_mode = #tpu.pipeline_mode<synchronous>, transform_indices = @transform_2, window_bounds = array<i64: 1, 640>}, {pipeline_mode = #tpu.pipeline_mode<synchronous>, transform_indices = @transform_3, window_bounds = array<i64: 640, 256>}, {pipeline_mode = #tpu.pipeline_mode<synchronous>, transform_indices = @transform_4, window_bounds = array<i64: 1, 256>}, {pipeline_mode = #tpu.pipeline_mode<synchronous>, transform_indices = @transform_5, window_bounds = array<i64: 256, 128>}, {pipeline_mode = #tpu.pipeline_mode<synchronous>, transform_indices = @transform_6, window_bounds = array<i64: 1, 128>}, {pipeline_mode = #tpu.pipeline_mode<synchronous>, transform_indices = @transform_7, window_bounds = array<i64: 128, 128>}, {pipeline_mode = #tpu.pipeline_mode<synchronous>, transform_indices = @transform_8, window_bounds = array<i64: 1, 128>}, {pipeline_mode = #tpu.pipeline_mode<synchronous>, transform_indices = @transform_9, window_bounds = array<i64: 128, 128>}, {pipeline_mode = #tpu.pipeline_mode<synchronous>, transform_indices = @transform_10, window_bounds = array<i64: 1, 128>}, {transform_indices = @transform_11, window_bounds = array<i64: 16, 128>}]} {
    %c0 = arith.constant 0 : index
    %c0_0 = arith.constant 0 : index
    %0 = vector.load %arg1[%c0, %c0_0] : memref<16x1000xbf16, #tpu.memory_space<vmem>>, vector<16x1000xbf16>
    %c0_1 = arith.constant 0 : index
    %c0_2 = arith.constant 0 : index
    %1 = vector.load %arg2[%c0_1, %c0_2] : memref<1000x640xbf16, #tpu.memory_space<vmem>>, vector<1000x640xbf16>
    %cst = arith.constant dense<0.000000e+00> : vector<16x640xf32>
    %2 = tpu.matmul %0, %1, %cst {dimension_numbers = #tpu.dot_dimension_numbers<[1], [0], [0], [1], [0, 0, 1, 1], [], []>} : vector<16x1000xbf16>, vector<1000x640xbf16>, vector<16x640xf32> -> vector<16x640xf32>
    %c0_3 = arith.constant 0 : index
    %c0_4 = arith.constant 0 : index
    %3 = vector.load %arg3[%c0_3, %c0_4] : memref<1x640xf32, #tpu.memory_space<vmem>>, vector<1x640xf32>
    %4 = vector.broadcast %3 : vector<1x640xf32> to vector<16x640xf32>
    %5 = arith.addf %2, %4 : vector<16x640xf32>
    %cst_5 = arith.constant 0.000000e+00 : f32
    %6 = vector.broadcast %cst_5 : f32 to vector<16x640xf32>
    %7 = arith.maximumf %5, %6 : vector<16x640xf32>
    %8 = arith.truncf %7 : vector<16x640xf32> to vector<16x640xbf16>
    %c0_6 = arith.constant 0 : index
    %c0_7 = arith.constant 0 : index
    %9 = vector.load %arg4[%c0_6, %c0_7] : memref<640x256xbf16, #tpu.memory_space<vmem>>, vector<640x256xbf16>
    %cst_8 = arith.constant dense<0.000000e+00> : vector<16x256xf32>
    %10 = tpu.matmul %8, %9, %cst_8 {dimension_numbers = #tpu.dot_dimension_numbers<[1], [0], [0], [1], [0, 0, 1, 1], [], []>} : vector<16x640xbf16>, vector<640x256xbf16>, vector<16x256xf32> -> vector<16x256xf32>
    %c0_9 = arith.constant 0 : index
    %c0_10 = arith.constant 0 : index
    %11 = vector.load %arg5[%c0_9, %c0_10] : memref<1x256xf32, #tpu.memory_space<vmem>>, vector<1x256xf32>
    %12 = vector.broadcast %11 : vector<1x256xf32> to vector<16x256xf32>
    %13 = arith.addf %10, %12 : vector<16x256xf32>
    %cst_11 = arith.constant 0.000000e+00 : f32
    %14 = vector.broadcast %cst_11 : f32 to vector<16x256xf32>
    %15 = arith.maximumf %13, %14 : vector<16x256xf32>
    %16 = arith.truncf %15 : vector<16x256xf32> to vector<16x256xbf16>
    %c0_12 = arith.constant 0 : index
    %c0_13 = arith.constant 0 : index
    %17 = vector.load %arg6[%c0_12, %c0_13] : memref<256x128xbf16, #tpu.memory_space<vmem>>, vector<256x128xbf16>
    %cst_14 = arith.constant dense<0.000000e+00> : vector<16x128xf32>
    %18 = tpu.matmul %16, %17, %cst_14 {dimension_numbers = #tpu.dot_dimension_numbers<[1], [0], [0], [1], [0, 0, 1, 1], [], []>} : vector<16x256xbf16>, vector<256x128xbf16>, vector<16x128xf32> -> vector<16x128xf32>
    %c0_15 = arith.constant 0 : index
    %c0_16 = arith.constant 0 : index
    %19 = vector.load %arg7[%c0_15, %c0_16] : memref<1x128xf32, #tpu.memory_space<vmem>>, vector<1x128xf32>
    %20 = vector.broadcast %19 : vector<1x128xf32> to vector<16x128xf32>
    %21 = arith.addf %18, %20 : vector<16x128xf32>
    %cst_17 = arith.constant 0.000000e+00 : f32
    %22 = vector.broadcast %cst_17 : f32 to vector<16x128xf32>
    %23 = arith.maximumf %21, %22 : vector<16x128xf32>
    %24 = arith.truncf %23 : vector<16x128xf32> to vector<16x128xbf16>
    %c0_18 = arith.constant 0 : index
    %c0_19 = arith.constant 0 : index
    %25 = vector.load %arg8[%c0_18, %c0_19] : memref<128x128xbf16, #tpu.memory_space<vmem>>, vector<128x128xbf16>
    %cst_20 = arith.constant dense<0.000000e+00> : vector<16x128xf32>
    %26 = tpu.matmul %24, %25, %cst_20 {dimension_numbers = #tpu.dot_dimension_numbers<[1], [0], [0], [1], [0, 0, 1, 1], [], []>} : vector<16x128xbf16>, vector<128x128xbf16>, vector<16x128xf32> -> vector<16x128xf32>
    %c0_21 = arith.constant 0 : index
    %c0_22 = arith.constant 0 : index
    %27 = vector.load %arg9[%c0_21, %c0_22] : memref<1x128xf32, #tpu.memory_space<vmem>>, vector<1x128xf32>
    %28 = vector.broadcast %27 : vector<1x128xf32> to vector<16x128xf32>
    %29 = arith.addf %26, %28 : vector<16x128xf32>
    %cst_23 = arith.constant 0.000000e+00 : f32
    %30 = vector.broadcast %cst_23 : f32 to vector<16x128xf32>
    %31 = arith.maximumf %29, %30 : vector<16x128xf32>
    %32 = arith.truncf %31 : vector<16x128xf32> to vector<16x128xbf16>
    %c0_24 = arith.constant 0 : index
    %c0_25 = arith.constant 0 : index
    %33 = vector.load %arg10[%c0_24, %c0_25] : memref<128x128xbf16, #tpu.memory_space<vmem>>, vector<128x128xbf16>
    %cst_26 = arith.constant dense<0.000000e+00> : vector<16x128xf32>
    %34 = tpu.matmul %32, %33, %cst_26 {dimension_numbers = #tpu.dot_dimension_numbers<[1], [0], [0], [1], [0, 0, 1, 1], [], []>} : vector<16x128xbf16>, vector<128x128xbf16>, vector<16x128xf32> -> vector<16x128xf32>
    %c0_27 = arith.constant 0 : index
    %c0_28 = arith.constant 0 : index
    %35 = vector.load %arg11[%c0_27, %c0_28] : memref<1x128xf32, #tpu.memory_space<vmem>>, vector<1x128xf32>
    %36 = vector.broadcast %35 : vector<1x128xf32> to vector<16x128xf32>
    %37 = arith.addf %34, %36 : vector<16x128xf32>
    %c0_29 = arith.constant 0 : index
    %c0_30 = arith.constant 0 : index
    %38 = vector.load %arg12[%c0_29, %c0_30] : memref<16x128xf32, #tpu.memory_space<vmem>>, vector<16x128xf32>
    tpu.vector_store %arg12[%c0_29, %c0_30], %37 {strides = array<i32>} : memref<16x128xf32, #tpu.memory_space<vmem>>, vector<16x128xf32>,
    return
  }
  func.func @transform_0(%arg0: i32) -> (i32, i32) {
    %c0_i32 = arith.constant 0 : i32
    %c0_i32_0 = arith.constant 0 : i32
    return %arg0, %c0_i32 : i32, i32
  }
  func.func @transform_1(%arg0: i32) -> (i32, i32) {
    %c0_i32 = arith.constant 0 : i32
    %c0_i32_0 = arith.constant 0 : i32
    %c0_i32_1 = arith.constant 0 : i32
    return %c0_i32, %c0_i32_0 : i32, i32
  }
  func.func @transform_2(%arg0: i32) -> (i32, i32) {
    %c0_i32 = arith.constant 0 : i32
    %c0_i32_0 = arith.constant 0 : i32
    %c0_i32_1 = arith.constant 0 : i32
    return %c0_i32, %c0_i32_0 : i32, i32
  }
  func.func @transform_3(%arg0: i32) -> (i32, i32) {
    %c0_i32 = arith.constant 0 : i32
    %c0_i32_0 = arith.constant 0 : i32
    %c0_i32_1 = arith.constant 0 : i32
    return %c0_i32, %c0_i32_0 : i32, i32
  }
  func.func @transform_4(%arg0: i32) -> (i32, i32) {
    %c0_i32 = arith.constant 0 : i32
    %c0_i32_0 = arith.constant 0 : i32
    %c0_i32_1 = arith.constant 0 : i32
    return %c0_i32, %c0_i32_0 : i32, i32
  }
  func.func @transform_5(%arg0: i32) -> (i32, i32) {
    %c0_i32 = arith.constant 0 : i32
    %c0_i32_0 = arith.constant 0 : i32
    %c0_i32_1 = arith.constant 0 : i32
    return %c0_i32, %c0_i32_0 : i32, i32
  }
  func.func @transform_6(%arg0: i32) -> (i32, i32) {
    %c0_i32 = arith.constant 0 : i32
    %c0_i32_0 = arith.constant 0 : i32
    %c0_i32_1 = arith.constant 0 : i32
    return %c0_i32, %c0_i32_0 : i32, i32
  }
  func.func @transform_7(%arg0: i32) -> (i32, i32) {
    %c0_i32 = arith.constant 0 : i32
    %c0_i32_0 = arith.constant 0 : i32
    %c0_i32_1 = arith.constant 0 : i32
    return %c0_i32, %c0_i32_0 : i32, i32
  }
  func.func @transform_8(%arg0: i32) -> (i32, i32) {
    %c0_i32 = arith.constant 0 : i32
    %c0_i32_0 = arith.constant 0 : i32
    %c0_i32_1 = arith.constant 0 : i32
    return %c0_i32, %c0_i32_0 : i32, i32
  }
  func.func @transform_9(%arg0: i32) -> (i32, i32) {
    %c0_i32 = arith.constant 0 : i32
    %c0_i32_0 = arith.constant 0 : i32
    %c0_i32_1 = arith.constant 0 : i32
    return %c0_i32, %c0_i32_0 : i32, i32
  }
  func.func @transform_10(%arg0: i32) -> (i32, i32) {
    %c0_i32 = arith.constant 0 : i32
    %c0_i32_0 = arith.constant 0 : i32
    %c0_i32_1 = arith.constant 0 : i32
    return %c0_i32, %c0_i32_0 : i32, i32
  }
  func.func @transform_11(%arg0: i32) -> (i32, i32) {
    %c0_i32 = arith.constant 0 : i32
    %c0_i32_0 = arith.constant 0 : i32
    return %arg0, %c0_i32 : i32, i32
  }
}

</mosaic_0001>

<bundles_post_ra>
// kernel: mlp_forward.1
= control target key start
LH: loop header
LB: loop body
LE: loop exit
PB: predicated region body
PF: predicated region fallthrough
CT: control target
= control target key end

     0   :  { %16 = vsyncpa [#allocation3], 0  ;;  %s5521_s0 = inlined_call_operand.vmem [shape: bf16[16,1000], index: 0, kind: input, shape index: {}]   ;;  %s5522_s1 = inlined_call_operand.hbm [shape: bf16[1000,640], index: 1, kind: input, shape index: {}]   ;;  %s5523_s2 = inlined_call_operand.hbm [shape: f32[1,640], index: 2, kind: input, shape index: {}]   ;;  %s5524_s3 = inlined_call_operand.hbm [shape: bf16[640,256], index: 3, kind: input, shape index: {}]   ;;  %s5525_s4 = inlined_call_operand.hbm [shape: f32[1,256], index: 4, kind: input, shape index: {}]   ;;  %s5526_s5 = inlined_call_operand.hbm [shape: bf16[256,128], index: 5, kind: input, shape index: {}]   ;;  %s5527_s6 = inlined_call_operand.hbm [shape: f32[1,128], index: 6, kind: input, shape index: {}]   ;;  %s5528_s7 = inlined_call_operand.hbm [shape: bf16[128,128], index: 7, kind: input, shape index: {}]   ;;  %s5529_s8 = inlined_call_operand.hbm [shape: f32[1,128], index: 8, kind: input, shape index: {}]   ;;  %s5530_s9 = inlined_call_operand.hbm [shape: bf16[128,128], index: 9, kind: input, shape index: {}]   ;;  %s5531_s10 = inlined_call_operand.hbm [shape: f32[1,128], index: 10, kind: input, shape index: {}]   ;;  %s5532_s11 = inlined_call_operand.vmem [shape: f32[16,128], index: 11, kind: output, shape index: {}]  }
   0x1   :  { %17 = vsyncpa [#allocation5], 0 }
   0x2   :  { %18 = vsyncpa [#allocation8], 0 }
   0x3   :  { %19 = vsyncpa [#allocation11], 0 }
   0x4   :  { %20 = vsyncpa [#allocation14], 0 }
   0x5   :  { %21 = vsyncpa [#allocation17], 0  ;;  %s5238_s17 = smov [#allocation4]   ;;  %s5239_s19 = smov [#allocation7]  }
   0x6   :  { %s42_s18 = sshll.u32 %s5238_s17, 4  ;;  %s64_s20 = sshll.u32 %s5239_s19, 4  ;;  %s43_s18 = int_to_ptr.vmem [resolvable:$true] %s42_s18  ;;  %s65_s20 = int_to_ptr.vmem [resolvable:$true] %s64_s20 }
   0x7   :  { %s5034_s21 = scalar_lea.vmem %s43_s18, 80  ;;  %s5038_s22 = scalar_lea.vmem %s43_s18, 96 }
   0x8   :  { %p5035_p0 = scmp.ne.s32.totalorder %s43_s18, %s5034_s21  ;;  %p5039_p1 = scmp.lt.s32.totalorder %s43_s18, %s43_s18 }
   0x9   :  { %p5040_p2 = scmp.lt.s32.totalorder %s5038_s22, %s5034_s21 }
   0xb   :  { %p5041_p3 = por %p5040_p2, %p5039_p1 }
   0xd   :  { %p5042_p4 = pnand %p5041_p3, %p5035_p0 }
   0xf   :  { %5045 = shalt.err (!%p5042_p4)
}
  0x10   :  { %45 = dma.hbm_to_vmem [thread:$0]  %s5523_s2, 80, %s43_s18, [#allocation5]  }
  0x11   :  { %s5054_s25 = scalar_lea.vmem %s65_s20, 32  ;;  %p5059_p6 = scmp.lt.s32.totalorder %s65_s20, %s65_s20 }
  0x12   :  { %p5055_p5 = scmp.ne.s32.totalorder %s65_s20, %s5054_s25  ;;  %p5060_p7 = scmp.lt.s32.totalorder %s5054_s25, %s5054_s25 }
  0x14   :  { %p5061_p8 = por %p5060_p7, %p5059_p6 }
  0x16   :  { %p5062_p9 = pnand %p5061_p8, %p5055_p5 }
  0x18   :  { %5065 = shalt.err (!%p5062_p9)
}
  0x19   :  { %67 = dma.hbm_to_vmem [thread:$0]  %s5525_s4, 32, %s65_s20, [#allocation8]  }
  0x1a   :  { %s5240_s28 = smov [#allocation10]   ;;  %s5241_s30 = smov [#allocation13]  }
  0x1b   :  { %s86_s29 = sshll.u32 %s5240_s28, 4  ;;  %s108_s12 = sshll.u32 %s5241_s30, 4  ;;  %s87_s29 = int_to_ptr.vmem [resolvable:$true] %s86_s29  ;;  %s109_s12 = int_to_ptr.vmem [resolvable:$true] %s108_s12 }
  0x1c   :  { %s5074_s13 = scalar_lea.vmem %s87_s29, 16  ;;  %s5078_s2 = scalar_lea.vmem %s87_s29, 32 }
  0x1d   :  { %p5075_p10 = scmp.ne.s32.totalorder %s87_s29, %s5074_s13  ;;  %p5079_p11 = scmp.lt.s32.totalorder %s87_s29, %s87_s29 }
  0x1e   :  { %p5080_p12 = scmp.lt.s32.totalorder %s5078_s2, %s5074_s13 }
  0x20   :  { %p5081_p13 = por %p5080_p12, %p5079_p11 }
  0x22   :  { %p5082_p0 = pnand %p5081_p13, %p5075_p10 }
  0x24   :  { %5085 = shalt.err (!%p5082_p0)
}
  0x25   :  { %89 = dma.hbm_to_vmem [thread:$0]  %s5527_s6, 16, %s87_s29, [#allocation11]  }
  0x26   :  { %s5094_s16 = scalar_lea.vmem %s109_s12, 16  ;;  %s5098_s4 = scalar_lea.vmem %s109_s12, 32 }
  0x27   :  { %p5095_p1 = scmp.ne.s32.totalorder %s109_s12, %s5094_s16  ;;  %p5099_p2 = scmp.lt.s32.totalorder %s109_s12, %s109_s12 }
  0x28   :  { %p5100_p3 = scmp.lt.s32.totalorder %s5098_s4, %s5094_s16 }
  0x2a   :  { %p5101_p4 = por %p5100_p3, %p5099_p2 }
  0x2c   :  { %p5102_p5 = pnand %p5101_p4, %p5095_p1 }
  0x2e   :  { %5105 = shalt.err (!%p5102_p5)
}
  0x2f   :  { %111 = dma.hbm_to_vmem [thread:$0]  %s5529_s8, 16, %s109_s12, [#allocation14]  }
  0x30   :  { %s5242_s19 = smov [#allocation2]  }
  0x31   :  { %s29_s20 = sshll.u32 %s5242_s19, 4  ;;  %s30_s20 = int_to_ptr.vmem [resolvable:$true] %s29_s20 }
  0x32   :  { %s5114_s21 = scalar_lea.vmem %s30_s20, 40000  ;;  %p5119_p7 = scmp.lt.s32.totalorder %s30_s20, %s30_s20 }
  0x33   :  { %p5115_p6 = scmp.ne.s32.totalorder %s30_s20, %s5114_s21  ;;  %p5120_p8 = scmp.lt.s32.totalorder %s5114_s21, %s5114_s21 }
  0x35   :  { %p5121_p9 = por %p5120_p8, %p5119_p7 }
  0x37   :  { %p5122_p10 = pnand %p5121_p9, %p5115_p6 }
  0x39   :  { %5125 = shalt.err (!%p5122_p10)
}
  0x3a   :  { %s5243_s6 = smov 320   ;;  %s5244_s22 = smov 20  }
  0x3b   :  { %35 = dma.hbm_to_vmem [thread:$0]  %s5522_s1, 40000, %s30_s20, [#allocation3], %s5243_s6, %s5243_s6, %s5244_s22  }
  0x3c   :  { %s5245_s25 = smov [#allocation6]  }
  0x3d   :  { %s51_s26 = sshll.u32 %s5245_s25, 4  ;;  %s52_s26 = int_to_ptr.vmem [resolvable:$true] %s51_s26 }
  0x3e   :  { %s5134_s8 = scalar_lea.vmem %s52_s26, 10240  ;;  %p5139_p12 = scmp.lt.s32.totalorder %s52_s26, %s52_s26 }
  0x3f   :  { %p5135_p11 = scmp.ne.s32.totalorder %s52_s26, %s5134_s8  ;;  %p5140_p13 = scmp.lt.s32.totalorder %s5134_s8, %s5134_s8 }
  0x41   :  { %p5141_p0 = por %p5140_p13, %p5139_p12 }
  0x43   :  { %p5142_p1 = pnand %p5141_p0, %p5135_p11 }
  0x45   :  { %5145 = shalt.err (!%p5142_p1)
}
  0x46   :  { %s5246_s27 = smov 128   ;;  %s5247_s28 = smov 8  }
  0x47   :  { %57 = dma.hbm_to_vmem [thread:$0]  %s5524_s3, 10240, %s52_s26, [#allocation5], %s5246_s27, %s5246_s27, %s5247_s28  }
  0x48   :  { %s5248_s12 = smov [#allocation9]  }
  0x49   :  { %s73_s13 = sshll.u32 %s5248_s12, 4  ;;  %s74_s13 = int_to_ptr.vmem [resolvable:$true] %s73_s13 }
  0x4a   :  { %s5154_s1 = scalar_lea.vmem %s74_s13, 2048  ;;  %p5159_p3 = scmp.lt.s32.totalorder %s74_s13, %s74_s13 }
  0x4b   :  { %p5155_p2 = scmp.ne.s32.totalorder %s74_s13, %s5154_s1  ;;  %p5160_p4 = scmp.lt.s32.totalorder %s5154_s1, %s5154_s1 }
  0x4d   :  { %p5161_p5 = por %p5160_p4, %p5159_p3 }
  0x4f   :  { %p5162_p6 = pnand %p5161_p5, %p5155_p2 }
  0x51   :  { %5165 = shalt.err (!%p5162_p6)
}
  0x52   :  { %s5249_s2 = smov 64   ;;  %s5250_s14 = smov 4  }
  0x53   :  { %79 = dma.hbm_to_vmem [thread:$0]  %s5526_s5, 2048, %s74_s13, [#allocation8], %s5249_s2, %s5249_s2, %s5250_s14  }
  0x54   :  { %s5251_s4 = smov [#allocation12]   ;;  %s5252_s3 = smov [#allocation15]  }
  0x55   :  { %s95_s17 = sshll.u32 %s5251_s4, 4  ;;  %s117_s18 = sshll.u32 %s5252_s3, 4  ;;  %s96_s17 = int_to_ptr.vmem [resolvable:$true] %s95_s17  ;;  %s118_s18 = int_to_ptr.vmem [resolvable:$true] %s117_s18 }
  0x56   :  { %s5174_s19 = scalar_lea.vmem %s96_s17, 1024  ;;  %p5179_p8 = scmp.lt.s32.totalorder %s96_s17, %s96_s17 }
  0x57   :  { %p5175_p7 = scmp.ne.s32.totalorder %s96_s17, %s5174_s19  ;;  %p5180_p9 = scmp.lt.s32.totalorder %s5174_s19, %s5174_s19 }
  0x59   :  { %p5181_p10 = por %p5180_p9, %p5179_p8 }
  0x5b   :  { %p5182_p11 = pnand %p5181_p10, %p5175_p7 }
  0x5d   :  { %5185 = shalt.err (!%p5182_p11)
}
  0x5e   :  { %101 = dma.hbm_to_vmem [thread:$0]  %s5528_s7, 1024, %s96_s17, [#allocation11], %s5249_s2, %s5249_s2, %s5250_s14  }
  0x5f   :  { %s5194_s6 = scalar_lea.vmem %s118_s18, 1024  ;;  %p5199_p13 = scmp.lt.s32.totalorder %s118_s18, %s118_s18 }
  0x60   :  { %p5195_p12 = scmp.ne.s32.totalorder %s118_s18, %s5194_s6  ;;  %p5200_p0 = scmp.lt.s32.totalorder %s5194_s6, %s5194_s6 }
  0x62   :  { %p5201_p1 = por %p5200_p0, %p5199_p13 }
  0x64   :  { %p5202_p2 = pnand %p5201_p1, %p5195_p12 }
  0x66   :  { %5205 = shalt.err (!%p5202_p2)
}
  0x67   :  { %123 = dma.hbm_to_vmem [thread:$0]  %s5530_s9, 1024, %s118_s18, [#allocation14], %s5249_s2, %s5249_s2, %s5250_s14  }
  0x68   :  { %s5253_s23 = smov [#allocation16]  }
  0x69   :  { %s130_s24 = sshll.u32 %s5253_s23, 4  ;;  %s131_s24 = int_to_ptr.vmem [resolvable:$true] %s130_s24 }
  0x6a   :  { %s5214_s25 = scalar_lea.vmem %s131_s24, 16  ;;  %s5218_s26 = scalar_lea.vmem %s131_s24, 32 }
  0x6b   :  { %p5215_p3 = scmp.ne.s32.totalorder %s131_s24, %s5214_s25  ;;  %p5219_p4 = scmp.lt.s32.totalorder %s131_s24, %s131_s24 }
  0x6c   :  { %p5220_p5 = scmp.lt.s32.totalorder %s5218_s26, %s5214_s25 }
  0x6e   :  { %p5221_p6 = por %p5220_p5, %p5219_p4 }
  0x70   :  { %p5222_p7 = pnand %p5221_p6, %p5215_p3 }
  0x72   :  { %5225 = shalt.err (!%p5222_p7)
}
  0x73   :  { %133 = dma.hbm_to_vmem [thread:$0]  %s5531_s10, 16, %s131_s24, [#allocation17]  }
  0x74   :  { %5226 = dma.done.wait [#allocation3], 40000  }
  0x75   :  { %5227 = vsyncadd [#allocation3], 4294927296 }
  0x76   :  { %5228 = dma.done.wait [#allocation5], 10320  }
  0x77   :  { %5229 = vsyncadd [#allocation5], 4294956976 }
  0x78   :  { %5230 = dma.done.wait [#allocation8], 2080  }
  0x79   :  { %5231 = vsyncadd [#allocation8], 4294965216 }
  0x7a   :  { %5232 = dma.done.wait [#allocation11], 1040  }
  0x7b   :  { %5233 = vsyncadd [#allocation11], 4294966256 }
  0x7c   :  { %5234 = dma.done.wait [#allocation14], 1040  }
  0x7d   :  { %5235 = vsyncadd [#allocation14], 4294966256 }
  0x7e   :  { %5236 = dma.done.wait [#allocation17], 16  }
  0x7f   :  { %5237 = vsyncadd [#allocation17], 4294967280  ;;  %v4435_v0 = vld [vmem:[#allocation2 + $0x11c] ss:$20 sps:$4 sm:$0xff]   ;;  %v4439_v2 = vld [vmem:[#allocation2 + $0x118] ss:$20 sps:$4 sm:$0xff]  }
  0x80   :  { %v4437_v1 = vld [vmem:[#allocation2 + $0x39c] ss:$20 sps:$4 sm:$0xff]   ;;  %2259 = vmatprep.subr.bf16.mxu0 %v4435_v0  ;;  %v4440_v3 = vld [vmem:[#allocation2 + $0x398] ss:$20 sps:$4 sm:$0xff]   ;;  %v4441_v4 = vld [vmem:[#allocation2 + $0xf4] ss:$20 sps:$4 sm:$0xff]  }
  0x81   :  { %2302 = vmatprep.subr.bf16.mxu1 %v4437_v1  ;;  %2260 = vmatpush1.bf16.msra.mxu0 %v4439_v2  ;;  %v4443_v5 = vld [vmem:[#allocation2 + $0x374] ss:$20 sps:$4 sm:$0xff]   ;;  %v4445_v6 = vld [vmem:[#allocation2 + $0xf0] ss:$20 sps:$4 sm:$0xff]   ;;  %v4447_v8 = vld [vmem:[#allocation2 + $0xcc] ss:$20 sps:$4 sm:$0xff]  }
  0x82   :  { %2303 = vmatpush1.bf16.msra.mxu1 %v4440_v3  ;;  %2261 = vmatprep.subr.bf16.mxu0 %v4441_v4  ;;  %v4446_v7 = vld [vmem:[#allocation2 + $0x370] ss:$20 sps:$4 sm:$0xff]   ;;  %v4449_v9 = vld [vmem:[#allocation2 + $0x34c] ss:$20 sps:$4 sm:$0xff]   ;;  %v4451_v10 = vld [vmem:[#allocation2 + $0xc8] ss:$20 sps:$4 sm:$0xff]  }
  0x83   :  { %2304 = vmatprep.subr.bf16.mxu1 %v4443_v5  ;;  %v4452_v11 = vld [vmem:[#allocation2 + $0x348] ss:$20 sps:$4 sm:$0xff]   ;;  %v4453_v12 = vld [vmem:[#allocation2 + $0xa4] ss:$20 sps:$4 sm:$0xff]   ;;  %v4457_v14 = vld [vmem:[#allocation2 + $0xa0] ss:$20 sps:$4 sm:$0xff]  }
  0x84   :  { %v4455_v13 = vld [vmem:[#allocation2 + $0x324] ss:$20 sps:$4 sm:$0xff]   ;;  %v4458_v15 = vld [vmem:[#allocation2 + $0x320] ss:$20 sps:$4 sm:$0xff]   ;;  %v4459_v16 = vld [vmem:[#allocation2 + $0x7c] ss:$20 sps:$4 sm:$0xff]  }
  0x85   :  { %2262 = vmatpush1.bf16.msra.mxu0 %v4445_v6  ;;  %v4461_v17 = vld [vmem:[#allocation2 + $0x2fc] ss:$20 sps:$4 sm:$0xff]   ;;  %v4463_v18 = vld [vmem:[#allocation2 + $0x78] ss:$20 sps:$4 sm:$0xff]   ;;  %v4465_v20 = vld [vmem:[#allocation2 + $0x54] ss:$20 sps:$4 sm:$0xff]  }
  0x86   :  { %2305 = vmatpush1.bf16.msra.mxu1 %v4446_v7  ;;  %2263 = vmatprep.subr.bf16.mxu0 %v4447_v8  ;;  %v4464_v19 = vld [vmem:[#allocation2 + $0x2f8] ss:$20 sps:$4 sm:$0xff]   ;;  %v4467_v21 = vld [vmem:[#allocation2 + $0x2d4] ss:$20 sps:$4 sm:$0xff]   ;;  %v4469_v22 = vld [vmem:[#allocation2 + $0x50] ss:$20 sps:$4 sm:$0xff]  }
  0x87   :  { %2306 = vmatprep.subr.bf16.mxu1 %v4449_v9  ;;  %v4470_v23 = vld [vmem:[#allocation2 + $0x2d0] ss:$20 sps:$4 sm:$0xff]   ;;  %v4471_v24 = vld [vmem:[#allocation2 + $0x2c] ss:$20 sps:$4 sm:$0xff]   ;;  %v4475_v26 = vld [vmem:[#allocation2 + $0x28] ss:$20 sps:$4 sm:$0xff]  }
  0x88   :  { %v4473_v25 = vld [vmem:[#allocation2 + $0x2ac] ss:$20 sps:$4 sm:$0xff]   ;;  %v4476_v27 = vld [vmem:[#allocation2 + $0x2a8] ss:$20 sps:$4 sm:$0xff]   ;;  %v4477_v28 = vld [vmem:[#allocation2 + $0x4] ss:$20 sps:$4 sm:$0xff]  }
  0x89   :  { %2264 = vmatpush1.bf16.msra.mxu0 %v4451_v10  ;;  %v4479_v29 = vld [vmem:[#allocation2 + $0x284] ss:$20 sps:$4 sm:$0xff]   ;;  %v4481_v30 = vld [vmem:[#allocation2] ss:$20 sps:$4 sm:$0xff]   ;;  %v4483_v32 = vld [vmem:[#allocation2 + $0x25c] ss:$20 sps:$4 sm:$0xff]  }
  0x8a   :  { %2307 = vmatpush1.bf16.msra.mxu1 %v4452_v11  ;;  %2265 = vmatprep.subr.bf16.mxu0 %v4453_v12  ;;  %v4482_v31 = vld [vmem:[#allocation2 + $0x280] ss:$20 sps:$4 sm:$0xff]   ;;  %v4485_v33 = vld [vmem:[#allocation2 + $0x4dc] ss:$20 sps:$4 sm:$0xff]   ;;  %v4487_v34 = vld [vmem:[#allocation2 + $0x258] ss:$20 sps:$4 sm:$0xff]  }
  0x8b   :  { %2308 = vmatprep.subr.bf16.mxu1 %v4455_v13  ;;  %v4488_v35 = vld [vmem:[#allocation2 + $0x4d8] ss:$20 sps:$4 sm:$0xff]   ;;  %v4489_v36 = vld [vmem:[#allocation2 + $0x234] ss:$20 sps:$4 sm:$0xff]   ;;  %v4493_v38 = vld [vmem:[#allocation2 + $0x230] ss:$20 sps:$4 sm:$0xff]  }
  0x8c   :  { %v4491_v37 = vld [vmem:[#allocation2 + $0x4b4] ss:$20 sps:$4 sm:$0xff]   ;;  %v4494_v39 = vld [vmem:[#allocation2 + $0x4b0] ss:$20 sps:$4 sm:$0xff]   ;;  %v4495_v40 = vld [vmem:[#allocation2 + $0x20c] ss:$20 sps:$4 sm:$0xff]  }
  0x8d   :  { %2266 = vmatpush1.bf16.msra.mxu0 %v4457_v14  ;;  %v4497_v41 = vld [vmem:[#allocation2 + $0x48c] ss:$20 sps:$4 sm:$0xff]   ;;  %v4499_v42 = vld [vmem:[#allocation2 + $0x208] ss:$20 sps:$4 sm:$0xff]   ;;  %v4501_v44 = vld [vmem:[#allocation2 + $0x1e4] ss:$20 sps:$4 sm:$0xff]  }
  0x8e   :  { %2309 = vmatpush1.bf16.msra.mxu1 %v4458_v15  ;;  %2267 = vmatprep.subr.bf16.mxu0 %v4459_v16  ;;  %v4500_v43 = vld [vmem:[#allocation2 + $0x488] ss:$20 sps:$4 sm:$0xff]   ;;  %v4503_v45 = vld [vmem:[#allocation2 + $0x464] ss:$20 sps:$4 sm:$0xff]   ;;  %v4505_v46 = vld [vmem:[#allocation2 + $0x1e0] ss:$20 sps:$4 sm:$0xff]  }
  0x8f   :  { %2310 = vmatprep.subr.bf16.mxu1 %v4461_v17  ;;  %v4506_v47 = vld [vmem:[#allocation2 + $0x460] ss:$20 sps:$4 sm:$0xff]   ;;  %v166_v50 = vld [vmem:[%s5521_s0 + $0x8] sm:$0xff]  ;;  %v4507_v52 = vld [vmem:[#allocation2 + $0x1bc] ss:$20 sps:$4 sm:$0xff]   ;;  %vm2239_vm0 = vcmask 850944  }
  0x90   :  { %v165_v48 = vld [vmem:[%s5521_s0] sm:$0xff]  ;;  %v170_v51 = vld [vmem:[%s5521_s0 + $0x28] sm:$0xff]  ;;  %v4509_v55 = vld [vmem:[#allocation2 + $0x43c] ss:$20 sps:$4 sm:$0xff]   ;;  %vm2243_vm1 = vcmask 1043456   ;;  %vm5256_vm2 = vmmov 0  }
  0x91   :  { %2268 = vmatpush1.bf16.msra.mxu0 %v4463_v18  ;;  %v169_v49 = vld [vmem:[%s5521_s0 + $0x20] sm:$0xff]  ;;  %v5361_v54 = vcombine.high %v166_v50, %v170_v51  ;;  %v4511_v56 = vld [vmem:[#allocation2 + $0x1b8] ss:$20 sps:$4 sm:$0xff]   ;;  %v4513_v58 = vld [vmem:[#allocation2 + $0x194] ss:$20 sps:$4 sm:$0xff]   ;;  %v5367_v9 = vcombine.low %v166_v50, %v170_v51 }
  0x92   :  { %2311 = vmatpush1.bf16.msra.mxu1 %v4464_v19  ;;  %2269 = vmatprep.subr.bf16.mxu0 %v4465_v20  ;;  %v5359_v53 = vcombine.high %v165_v48, %v169_v49  ;;  %v4512_v57 = vld [vmem:[#allocation2 + $0x438] ss:$20 sps:$4 sm:$0xff]   ;;  %v4515_v59 = vld [vmem:[#allocation2 + $0x414] ss:$20 sps:$4 sm:$0xff]   ;;  %v4517_v60 = vld [vmem:[#allocation2 + $0x190] ss:$20 sps:$4 sm:$0xff]   ;;  %v5365_v8 = vcombine.low %v165_v48, %v169_v49 }
  0x93   :  { %2312 = vmatprep.subr.bf16.mxu1 %v4467_v21  ;;  %2334 = vmatprep.mubr.bf16.mxu1 %v5361_v54  ;;  %v4518_v61 = vld [vmem:[#allocation2 + $0x410] ss:$20 sps:$4 sm:$0xff]   ;;  %v4519_v62 = vld [vmem:[#allocation2 + $0x16c] ss:$20 sps:$4 sm:$0xff]   ;;  %v4523_v0 = vld [vmem:[#allocation2 + $0x168] ss:$20 sps:$4 sm:$0xff]  }
  0x94   :  { %2291 = vmatprep.mubr.bf16.mxu0 %v5359_v53  ;;  %v4521_v63 = vld [vmem:[#allocation2 + $0x3ec] ss:$20 sps:$4 sm:$0xff]   ;;  %v4524_v1 = vld [vmem:[#allocation2 + $0x3e8] ss:$20 sps:$4 sm:$0xff]   ;;  %v4525_v2 = vld [vmem:[#allocation2 + $0x144] ss:$20 sps:$4 sm:$0xff]  }
  0x95   :  { %2270 = vmatpush1.bf16.msra.mxu0 %v4469_v22  ;;  %v4527_v3 = vld [vmem:[#allocation2 + $0x3c4] ss:$20 sps:$4 sm:$0xff]   ;;  %v4529_v4 = vld [vmem:[#allocation2 + $0x140] ss:$20 sps:$4 sm:$0xff]   ;;  %v4533_v6 = vld [vmem:[#allocation2 + $0x61c] ss:$20 sps:$4 sm:$0xff]  }
  0x96   :  { %2313 = vmatpush1.bf16.msra.mxu1 %v4470_v23  ;;  %2271 = vmatprep.subr.bf16.mxu0 %v4471_v24  ;;  %v4530_v5 = vld [vmem:[#allocation2 + $0x3c0] ss:$20 sps:$4 sm:$0xff]   ;;  %v4536_v7 = vld [vmem:[#allocation2 + $0x89c] ss:$20 sps:$4 sm:$0xff]   ;;  %v4531_v10 = vld [vmem:[#allocation2 + $0x618] ss:$20 sps:$4 sm:$0xff]  }
  0x97   :  { %2314 = vmatprep.subr.bf16.mxu1 %v4473_v25  ;;  %v4534_v11 = vld [vmem:[#allocation2 + $0x898] ss:$20 sps:$4 sm:$0xff]   ;;  %v4539_v12 = vld [vmem:[#allocation2 + $0x5f4] ss:$20 sps:$4 sm:$0xff]   ;;  %v4537_v14 = vld [vmem:[#allocation2 + $0x5f0] ss:$20 sps:$4 sm:$0xff]  }
  0x98   :  { %v4542_v13 = vld [vmem:[#allocation2 + $0x874] ss:$20 sps:$4 sm:$0xff]   ;;  %v4540_v15 = vld [vmem:[#allocation2 + $0x870] ss:$20 sps:$4 sm:$0xff]   ;;  %v4545_v16 = vld [vmem:[#allocation2 + $0x5cc] ss:$20 sps:$4 sm:$0xff]  }
  0x99   :  { %2272 = vmatpush1.bf16.msra.mxu0 %v4475_v26  ;;  %v4548_v17 = vld [vmem:[#allocation2 + $0x84c] ss:$20 sps:$4 sm:$0xff]   ;;  %v4543_v18 = vld [vmem:[#allocation2 + $0x5c8] ss:$20 sps:$4 sm:$0xff]   ;;  %v4551_v20 = vld [vmem:[#allocation2 + $0x5a4] ss:$20 sps:$4 sm:$0xff]  }
  0x9a   :  { %2315 = vmatpush1.bf16.msra.mxu1 %v4476_v27  ;;  %2273 = vmatprep.subr.bf16.mxu0 %v4477_v28  ;;  %v4546_v19 = vld [vmem:[#allocation2 + $0x848] ss:$20 sps:$4 sm:$0xff]   ;;  %v4554_v21 = vld [vmem:[#allocation2 + $0x824] ss:$20 sps:$4 sm:$0xff]   ;;  %v4549_v22 = vld [vmem:[#allocation2 + $0x5a0] ss:$20 sps:$4 sm:$0xff]  }
  0x9b   :  { %2316 = vmatprep.subr.bf16.mxu1 %v4479_v29  ;;  %v4552_v23 = vld [vmem:[#allocation2 + $0x820] ss:$20 sps:$4 sm:$0xff]   ;;  %v4557_v24 = vld [vmem:[#allocation2 + $0x57c] ss:$20 sps:$4 sm:$0xff]   ;;  %v4555_v26 = vld [vmem:[#allocation2 + $0x578] ss:$20 sps:$4 sm:$0xff]  }
  0x9c   :  { %v4560_v25 = vld [vmem:[#allocation2 + $0x7fc] ss:$20 sps:$4 sm:$0xff]   ;;  %v4558_v27 = vld [vmem:[#allocation2 + $0x7f8] ss:$20 sps:$4 sm:$0xff]   ;;  %v4563_v28 = vld [vmem:[#allocation2 + $0x554] ss:$20 sps:$4 sm:$0xff]  }
  0x9d   :  { %2274 = vmatpush1.bf16.msra.mxu0 %v4481_v30  ;;  %v4566_v29 = vld [vmem:[#allocation2 + $0x7d4] ss:$20 sps:$4 sm:$0xff]   ;;  %v4561_v30 = vld [vmem:[#allocation2 + $0x550] ss:$20 sps:$4 sm:$0xff]   ;;  %v4579_v50 = vld [vmem:[#allocation2 + $0x758] ss:$20 sps:$4 sm:$0xff]  }
  0x9e   :  { %2317 = vmatpush1.bf16.msra.mxu1 %v4482_v31  ;;  %2275 = vmatprep.subr.bf16.mxu0 %v4483_v32  ;;  %v5374_v31 = vld [vmem:[%s5521_s0 + $0x18] sm:$0xff] }
  0x9f   :  { %2318 = vmatprep.subr.bf16.mxu1 %v4485_v33  ;;  %v5379_v32 = vld [vmem:[%s5521_s0 + $0x38] sm:$0xff]  ;;  %v4564_v33 = vld [vmem:[#allocation2 + $0x7d0] ss:$20 sps:$4 sm:$0xff]  }
  0xa1   :  { %2276 = vmatpush2.bf16.msra.mxu0 %v4487_v34  ;;  %v4569_v34 = vld [vmem:[#allocation2 + $0x52c] ss:$20 sps:$4 sm:$0xff]  }
  0xa2   :  { %2319 = vmatpush2.bf16.msra.mxu1 %v4488_v35  ;;  %2277 = vmatprep.subr.bf16.mxu0 %v4489_v36  ;;  %v5383_v35 = vcombine.high %v5374_v31, %v5379_v32  ;;  %v4572_v36 = vld [vmem:[#allocation2 + $0x7ac] ss:$20 sps:$4 sm:$0xff]  }
  0xa3   :  { %2320 = vmatprep.subr.bf16.mxu1 %v4491_v37  ;;  %v5390_v37 = vld [vmem:[%s5521_s0 + $0x10] sm:$0xff] }
  0xa5   :  { %2278 = vmatpush2.bf16.msra.mxu0 %v4493_v38  ;;  %v5395_v38 = vld [vmem:[%s5521_s0 + $0x30] sm:$0xff] }
  0xa6   :  { %2321 = vmatpush2.bf16.msra.mxu1 %v4494_v39  ;;  %2279 = vmatprep.subr.bf16.mxu0 %v4495_v40  ;;  %v4567_v39 = vld [vmem:[#allocation2 + $0x528] ss:$20 sps:$4 sm:$0xff]   ;;  %v5399_v40 = vcombine.high %v5390_v37, %v5395_v38 }
  0xa7   :  { %2322 = vmatprep.subr.bf16.mxu1 %v4497_v41  ;;  %v4570_v41 = vld [vmem:[#allocation2 + $0x7a8] ss:$20 sps:$4 sm:$0xff]  }
  0xa9   :  { %2280 = vmatpush2.bf16.msra.mxu0 %v4499_v42  ;;  %v4575_v42 = vld [vmem:[#allocation2 + $0x504] ss:$20 sps:$4 sm:$0xff]  }
  0xaa   :  { %2323 = vmatpush2.bf16.msra.mxu1 %v4500_v43  ;;  %2281 = vmatprep.subr.bf16.mxu0 %v4501_v44  ;;  %v4578_v43 = vld [vmem:[#allocation2 + $0x784] ss:$20 sps:$4 sm:$0xff]   ;;  %v545_v44 = vld [vmem:[#allocation2 + $0x9b0] sm:$0xff] }
  0xab   :  { %2324 = vmatprep.subr.bf16.mxu1 %v4503_v45  ;;  %v4573_v45 = vld [vmem:[#allocation2 + $0x500] ss:$20 sps:$4 sm:$0xff]   ;;  %v4146_v48 = vcombine.high %v545_v44, %v545_v44  ;;  %v4145_v49 = vcombine.low %v545_v44, %v545_v44 }
  0xac   :  { %v4658_v44 = vld [vmem:[#allocation2 + $0x34] ss:$20 sps:$4 sm:$0xff]  }
  0xad   :  { %2282 = vmatpush2.bf16.msra.mxu0 %v4505_v46  ;;  %v4576_v46 = vld [vmem:[#allocation2 + $0x780] ss:$20 sps:$4 sm:$0xff]   ;;  %v2245_v51 = vsel %vm2243_vm1, %v4145_v49, 0 }
  0xae   :  { %2325 = vmatpush2.bf16.msra.mxu1 %v4506_v47  ;;  %2283 = vmatprep.subr.bf16.mxu0 %v4507_v52  ;;  %v4581_v47 = vld [vmem:[#allocation2 + $0x75c] ss:$20 sps:$4 sm:$0xff]   ;;  %v4586_v52 = vld [vmem:[#allocation2 + $0x734] ss:$20 sps:$4 sm:$0xff]  }
  0xaf   :  { %2326 = vmatprep.subr.bf16.mxu1 %v4509_v55  ;;  %v4589_v55 = vld [vmem:[#allocation2 + $0x98c] ss:$20 sps:$4 sm:$0xff]   ;;  %v4667_v49 = vld [vmem:[#allocation2 + $0x2b4] ss:$20 sps:$4 sm:$0xff]  }
  0xb1   :  { %2284 = vmatpush2.bf16.msra.mxu0 %v4511_v56  ;;  %v4584_v56 = vld [vmem:[#allocation2 + $0x730] ss:$20 sps:$4 sm:$0xff]  }
  0xb2   :  { %2327 = vmatpush2.bf16.msra.mxu1 %v4512_v57  ;;  %2285 = vmatprep.subr.bf16.mxu0 %v4513_v58  ;;  %v4587_v57 = vld [vmem:[#allocation2 + $0x988] ss:$20 sps:$4 sm:$0xff]   ;;  %v4592_v58 = vld [vmem:[#allocation2 + $0x70c] ss:$20 sps:$4 sm:$0xff]  }
  0xb3   :  { %2328 = vmatprep.subr.bf16.mxu1 %v4515_v59  ;;  %v4595_v59 = vld [vmem:[#allocation2 + $0x964] ss:$20 sps:$4 sm:$0xff]  }
  0xb5   :  { %2286 = vmatpush2.bf16.msra.mxu0 %v4517_v60  ;;  %v4590_v60 = vld [vmem:[#allocation2 + $0x708] ss:$20 sps:$4 sm:$0xff]  }
  0xb6   :  { %2329 = vmatpush2.bf16.msra.mxu1 %v4518_v61  ;;  %2287 = vmatprep.subr.bf16.mxu0 %v4519_v62  ;;  %v4593_v61 = vld [vmem:[#allocation2 + $0x960] ss:$20 sps:$4 sm:$0xff]   ;;  %v4598_v62 = vld [vmem:[#allocation2 + $0x6e4] ss:$20 sps:$4 sm:$0xff]  }
  0xb7   :  { %2330 = vmatprep.subr.bf16.mxu1 %v4521_v63  ;;  %v4601_v63 = vld [vmem:[#allocation2 + $0x93c] ss:$20 sps:$4 sm:$0xff]  }
  0xb9   :  { %2288 = vmatpush2.bf16.msra.mxu0 %v4523_v0  ;;  %v4596_v0 = vld [vmem:[#allocation2 + $0x6e0] ss:$20 sps:$4 sm:$0xff]  }
  0xba   :  { %2331 = vmatpush2.bf16.msra.mxu1 %v4524_v1  ;;  %2289 = vmatprep.subr.bf16.mxu0 %v4525_v2  ;;  %v4599_v1 = vld [vmem:[#allocation2 + $0x938] ss:$20 sps:$4 sm:$0xff]   ;;  %v4604_v2 = vld [vmem:[#allocation2 + $0x6bc] ss:$20 sps:$4 sm:$0xff]  }
  0xbb   :  { %2332 = vmatprep.subr.bf16.mxu1 %v4527_v3  ;;  %v4607_v3 = vld [vmem:[#allocation2 + $0x914] ss:$20 sps:$4 sm:$0xff]  }
  0xbd   :  { %2290 = vmatpush2.bf16.msra.mxu0 %v4529_v4  ;;  %v4602_v4 = vld [vmem:[#allocation2 + $0x6b8] ss:$20 sps:$4 sm:$0xff]  }
  0xbe   :  { %2333 = vmatpush2.bf16.msra.mxu1 %v4530_v5  ;;  %2345 = vmatprep.subr.bf16.mxu0 %v4533_v6  ;;  %v4605_v5 = vld [vmem:[#allocation2 + $0x910] ss:$20 sps:$4 sm:$0xff]   ;;  %v4610_v6 = vld [vmem:[#allocation2 + $0x694] ss:$20 sps:$4 sm:$0xff]  }
  0xbf   :  { %2388 = vmatprep.subr.bf16.mxu1 %v4536_v7  ;;  %v4613_v7 = vld [vmem:[#allocation2 + $0x8ec] ss:$20 sps:$4 sm:$0xff]  }
  0xc0   :  { %2292 = vmatmul.mubr.bf16.vlgmr.msra.gmra.mxu0 %v5365_v8 }
  0xc1   :  { %2335 = vmatmul.mubr.bf16.vlgmr.msra.gmra.mxu1 %v5367_v9  ;;  %2346 = vmatpush1.bf16.msra.mxu0 %v4531_v10  ;;  %v4608_v10 = vld [vmem:[#allocation2 + $0x690] ss:$20 sps:$4 sm:$0xff]  }
  0xc2   :  { %2389 = vmatpush1.bf16.msra.mxu1 %v4534_v11  ;;  %2347 = vmatprep.subr.bf16.mxu0 %v4539_v12  ;;  %v4611_v11 = vld [vmem:[#allocation2 + $0x8e8] ss:$20 sps:$4 sm:$0xff]   ;;  %v4616_v12 = vld [vmem:[#allocation2 + $0x66c] ss:$20 sps:$4 sm:$0xff]  }
  0xc3   :  { %2390 = vmatprep.subr.bf16.mxu1 %v4542_v13  ;;  %4151 = vmatprep.mubr.msk.bf16.mxu1 %vm2239_vm0, %v5383_v35  ;;  %v4619_v13 = vld [vmem:[#allocation2 + $0x8c4] ss:$20 sps:$4 sm:$0xff]  }
  0xc4   :  { %2377 = vmatprep.mubr.bf16.mxu0 %v5399_v40 }
  0xc5   :  { %2348 = vmatpush1.bf16.msra.mxu0 %v4537_v14  ;;  %v4614_v14 = vld [vmem:[#allocation2 + $0x668] ss:$20 sps:$4 sm:$0xff]  }
  0xc6   :  { %2391 = vmatpush1.bf16.msra.mxu1 %v4540_v15  ;;  %2349 = vmatprep.subr.bf16.mxu0 %v4545_v16  ;;  %v4617_v15 = vld [vmem:[#allocation2 + $0x8c0] ss:$20 sps:$4 sm:$0xff]   ;;  %v4622_v16 = vld [vmem:[#allocation2 + $0x644] ss:$20 sps:$4 sm:$0xff]  }
  0xc7   :  { %2392 = vmatprep.subr.bf16.mxu1 %v4548_v17  ;;  %v4625_v17 = vld [vmem:[#allocation2 + $0x124] ss:$20 sps:$4 sm:$0xff]  }
  0xc9   :  { %2350 = vmatpush1.bf16.msra.mxu0 %v4543_v18  ;;  %v4620_v18 = vld [vmem:[#allocation2 + $0x640] ss:$20 sps:$4 sm:$0xff]  }
  0xca   :  { %2393 = vmatpush1.bf16.msra.mxu1 %v4546_v19  ;;  %2351 = vmatprep.subr.bf16.mxu0 %v4551_v20  ;;  %v5406_v19 = vcombine.low %v5374_v31, %v5379_v32  ;;  %v4623_v20 = vld [vmem:[#allocation2 + $0x120] ss:$20 sps:$4 sm:$0xff]   ;;  %v4638_v32 = vld [vmem:[#allocation2 + $0xa8] ss:$20 sps:$4 sm:$0xff]  }
  0xcb   :  { %2394 = vmatprep.subr.bf16.mxu1 %v4554_v21  ;;  %v4628_v21 = vld [vmem:[#allocation2 + $0xfc] ss:$20 sps:$4 sm:$0xff]   ;;  %v4643_v31 = vld [vmem:[#allocation2 + $0x354] ss:$20 sps:$4 sm:$0xff]  }
  0xcd   :  { %2352 = vmatpush1.bf16.msra.mxu0 %v4549_v22  ;;  %v4631_v22 = vld [vmem:[#allocation2 + $0x3a4] ss:$20 sps:$4 sm:$0xff]  }
  0xce   :  { %2395 = vmatpush1.bf16.msra.mxu1 %v4552_v23  ;;  %2353 = vmatprep.subr.bf16.mxu0 %v4557_v24  ;;  %v5411_v23 = vcombine.low %v5390_v37, %v5395_v38  ;;  %v4626_v24 = vld [vmem:[#allocation2 + $0xf8] ss:$20 sps:$4 sm:$0xff]   ;;  %v4644_v37 = vld [vmem:[#allocation2 + $0x80] ss:$20 sps:$4 sm:$0xff]   ;;  %v4647_v38 = vld [vmem:[#allocation2 + $0x328] ss:$20 sps:$4 sm:$0xff]  }
  0xcf   :  { %2396 = vmatprep.subr.bf16.mxu1 %v4560_v25  ;;  %v4629_v25 = vld [vmem:[#allocation2 + $0x3a0] ss:$20 sps:$4 sm:$0xff]  }
  0xd1   :  { %2354 = vmatpush1.bf16.msra.mxu0 %v4555_v26  ;;  %v4634_v26 = vld [vmem:[#allocation2 + $0xd4] ss:$20 sps:$4 sm:$0xff]  }
  0xd2   :  { %2397 = vmatpush1.bf16.msra.mxu1 %v4558_v27  ;;  %2355 = vmatprep.subr.bf16.mxu0 %v4563_v28  ;;  %v4637_v27 = vld [vmem:[#allocation2 + $0x37c] ss:$20 sps:$4 sm:$0xff]  }
  0xd3   :  { %2398 = vmatprep.subr.bf16.mxu1 %v4566_v29  ;;  %v4632_v28 = vld [vmem:[#allocation2 + $0xd0] ss:$20 sps:$4 sm:$0xff]   ;;  %v4635_v29 = vld [vmem:[#allocation2 + $0x378] ss:$20 sps:$4 sm:$0xff]  }
  0xd5   :  { %2356 = vmatpush1.bf16.msra.mxu0 %v4561_v30  ;;  %v4640_v30 = vld [vmem:[#allocation2 + $0xac] ss:$20 sps:$4 sm:$0xff]  }
  0xd6   :  { %2399 = vmatpush1.bf16.msra.mxu1 %v4564_v33  ;;  %2357 = vmatprep.subr.bf16.mxu0 %v4569_v34  ;;  %v4641_v33 = vld [vmem:[#allocation2 + $0x350] ss:$20 sps:$4 sm:$0xff]  }
  0xd7   :  { %2400 = vmatprep.subr.bf16.mxu1 %v4572_v36  ;;  %v4646_v34 = vld [vmem:[#allocation2 + $0x84] ss:$20 sps:$4 sm:$0xff]   ;;  %v4649_v36 = vld [vmem:[#allocation2 + $0x32c] ss:$20 sps:$4 sm:$0xff]  }
  0xd9   :  { %2358 = vmatpush1.bf16.msra.mxu0 %v4567_v39  ;;  %v4652_v39 = vld [vmem:[#allocation2 + $0x5c] ss:$20 sps:$4 sm:$0xff]  }
  0xda   :  { %2401 = vmatpush1.bf16.msra.mxu1 %v4570_v41  ;;  %2359 = vmatprep.subr.bf16.mxu0 %v4575_v42  ;;  %v4655_v41 = vld [vmem:[#allocation2 + $0x304] ss:$20 sps:$4 sm:$0xff]  }
  0xdb   :  { %2402 = vmatprep.subr.bf16.mxu1 %v4578_v43  ;;  %v4650_v42 = vld [vmem:[#allocation2 + $0x58] ss:$20 sps:$4 sm:$0xff]   ;;  %v4653_v43 = vld [vmem:[#allocation2 + $0x300] ss:$20 sps:$4 sm:$0xff]  }
  0xdd   :  { %2360 = vmatpush1.bf16.msra.mxu0 %v4573_v45  ;;  %v4661_v45 = vld [vmem:[#allocation2 + $0x2dc] ss:$20 sps:$4 sm:$0xff]  }
  0xde   :  { %2403 = vmatpush1.bf16.msra.mxu1 %v4576_v46  ;;  %2361 = vmatprep.subr.bf16.mxu0 %v4581_v47  ;;  %v4656_v46 = vld [vmem:[#allocation2 + $0x30] ss:$20 sps:$4 sm:$0xff]   ;;  %v4659_v47 = vld [vmem:[#allocation2 + $0x2d8] ss:$20 sps:$4 sm:$0xff]  }
  0xdf   :  { %4150 = vmatprep.subr.msk.bf16.mxu1 %vm2243_vm1, %v4146_v48  ;;  %v4664_v48 = vld [vmem:[#allocation2 + $0xc] ss:$20 sps:$4 sm:$0xff]  }
  0xe1   :  { %2362 = vmatpush2.bf16.msra.mxu0 %v4579_v50  ;;  %v4662_v50 = vld [vmem:[#allocation2 + $0x8] ss:$20 sps:$4 sm:$0xff]  }
  0xe2   :  { %2407 = vmatpush2.bf16.msra.mxu1 %v2245_v51  ;;  %2363 = vmatprep.subr.bf16.mxu0 %v4586_v52  ;;  %v4665_v51 = vld [vmem:[#allocation2 + $0x2b0] ss:$20 sps:$4 sm:$0xff]  }
  0xe3   :  { %2408 = vmatprep.subr.bf16.mxu1 %v4589_v55  ;;  %v4670_v52 = vld [vmem:[#allocation2 + $0x264] ss:$20 sps:$4 sm:$0xff]   ;;  %v4673_v55 = vld [vmem:[#allocation2 + $0x28c] ss:$20 sps:$4 sm:$0xff]  }
  0xe5   :  { %2364 = vmatpush2.bf16.msra.mxu0 %v4584_v56  ;;  %v4668_v56 = vld [vmem:[#allocation2 + $0x260] ss:$20 sps:$4 sm:$0xff]  }
  0xe6   :  { %2409 = vmatpush2.bf16.msra.mxu1 %v4587_v57  ;;  %2365 = vmatprep.subr.bf16.mxu0 %v4592_v58  ;;  %v4671_v57 = vld [vmem:[#allocation2 + $0x288] ss:$20 sps:$4 sm:$0xff]  }
  0xe7   :  { %2410 = vmatprep.subr.bf16.mxu1 %v4595_v59  ;;  %v4676_v58 = vld [vmem:[#allocation2 + $0x23c] ss:$20 sps:$4 sm:$0xff]   ;;  %v4679_v59 = vld [vmem:[#allocation2 + $0x4e4] ss:$20 sps:$4 sm:$0xff]  }
  0xe9   :  { %2366 = vmatpush2.bf16.msra.mxu0 %v4590_v60  ;;  %v4674_v60 = vld [vmem:[#allocation2 + $0x238] ss:$20 sps:$4 sm:$0xff]  }
  0xea   :  { %2411 = vmatpush2.bf16.msra.mxu1 %v4593_v61  ;;  %2367 = vmatprep.subr.bf16.mxu0 %v4598_v62  ;;  %v4677_v61 = vld [vmem:[#allocation2 + $0x4e0] ss:$20 sps:$4 sm:$0xff]  }
  0xeb   :  { %2412 = vmatprep.subr.bf16.mxu1 %v4601_v63  ;;  %v4682_v62 = vld [vmem:[#allocation2 + $0x214] ss:$20 sps:$4 sm:$0xff]   ;;  %v4685_v63 = vld [vmem:[#allocation2 + $0x4bc] ss:$20 sps:$4 sm:$0xff]  }
  0xed   :  { %2368 = vmatpush2.bf16.msra.mxu0 %v4596_v0  ;;  %v4680_v0 = vld [vmem:[#allocation2 + $0x210] ss:$20 sps:$4 sm:$0xff]  }
  0xee   :  { %2413 = vmatpush2.bf16.msra.mxu1 %v4599_v1  ;;  %2369 = vmatprep.subr.bf16.mxu0 %v4604_v2  ;;  %v4683_v1 = vld [vmem:[#allocation2 + $0x4b8] ss:$20 sps:$4 sm:$0xff]  }
  0xef   :  { %2414 = vmatprep.subr.bf16.mxu1 %v4607_v3  ;;  %v4688_v2 = vld [vmem:[#allocation2 + $0x1ec] ss:$20 sps:$4 sm:$0xff]   ;;  %v4691_v3 = vld [vmem:[#allocation2 + $0x494] ss:$20 sps:$4 sm:$0xff]  }
  0xf1   :  { %2370 = vmatpush2.bf16.msra.mxu0 %v4602_v4  ;;  %v4686_v4 = vld [vmem:[#allocation2 + $0x1e8] ss:$20 sps:$4 sm:$0xff]  }
  0xf2   :  { %2415 = vmatpush2.bf16.msra.mxu1 %v4605_v5  ;;  %2371 = vmatprep.subr.bf16.mxu0 %v4610_v6  ;;  %v4689_v5 = vld [vmem:[#allocation2 + $0x490] ss:$20 sps:$4 sm:$0xff]  }
  0xf3   :  { %2416 = vmatprep.subr.bf16.mxu1 %v4613_v7  ;;  %v4694_v6 = vld [vmem:[#allocation2 + $0x1c4] ss:$20 sps:$4 sm:$0xff]   ;;  %v4697_v7 = vld [vmem:[#allocation2 + $0x46c] ss:$20 sps:$4 sm:$0xff]  }
  0xf5   :  { %2372 = vmatpush2.bf16.msra.mxu0 %v4608_v10  ;;  %v4692_v10 = vld [vmem:[#allocation2 + $0x1c0] ss:$20 sps:$4 sm:$0xff]  }
  0xf6   :  { %2417 = vmatpush2.bf16.msra.mxu1 %v4611_v11  ;;  %2373 = vmatprep.subr.bf16.mxu0 %v4616_v12  ;;  %v4695_v11 = vld [vmem:[#allocation2 + $0x468] ss:$20 sps:$4 sm:$0xff]  }
  0xf7   :  { %2418 = vmatprep.subr.bf16.mxu1 %v4619_v13  ;;  %v4700_v12 = vld [vmem:[#allocation2 + $0x19c] ss:$20 sps:$4 sm:$0xff]   ;;  %v4703_v13 = vld [vmem:[#allocation2 + $0x444] ss:$20 sps:$4 sm:$0xff]  }
  0xf9   :  { %2374 = vmatpush2.bf16.msra.mxu0 %v4614_v14  ;;  %v4698_v14 = vld [vmem:[#allocation2 + $0x198] ss:$20 sps:$4 sm:$0xff]  }
  0xfa   :  { %2419 = vmatpush2.bf16.msra.mxu1 %v4617_v15  ;;  %2375 = vmatprep.subr.bf16.mxu0 %v4622_v16  ;;  %v4701_v15 = vld [vmem:[#allocation2 + $0x440] ss:$20 sps:$4 sm:$0xff]  }
  0xfb   :  { %2431 = vmatprep.subr.bf16.mxu1 %v4625_v17  ;;  %v4706_v16 = vld [vmem:[#allocation2 + $0x174] ss:$20 sps:$4 sm:$0xff]   ;;  %v4709_v17 = vld [vmem:[#allocation2 + $0x41c] ss:$20 sps:$4 sm:$0xff]  }
  0xfd   :  { %2421 = vmatmul.mubr.bf16.vlgmr.msra.gmra.mxu1 %v5406_v19  ;;  %2376 = vmatpush2.bf16.msra.mxu0 %v4620_v18  ;;  %v4704_v18 = vld [vmem:[#allocation2 + $0x170] ss:$20 sps:$4 sm:$0xff]  }
  0xfe   :  { %2432 = vmatpush1.bf16.msra.mxu1 %v4623_v20  ;;  %2474 = vmatprep.subr.bf16.mxu0 %v4631_v22  ;;  %v4707_v20 = vld [vmem:[#allocation2 + $0x418] ss:$20 sps:$4 sm:$0xff]   ;;  %v4715_v22 = vld [vmem:[#allocation2 + $0x3f4] ss:$20 sps:$4 sm:$0xff]  }
  0xff   :  { %2433 = vmatprep.subr.bf16.mxu1 %v4628_v21  ;;  %2463 = vmatprep.mubr.bf16.mxu1 %v5359_v53  ;;  %v4712_v21 = vld [vmem:[#allocation2 + $0x14c] ss:$20 sps:$4 sm:$0xff]  }
 0x100   :  { %2378 = vmatmul.mubr.bf16.vlgmr.msra.gmra.mxu0 %v5411_v23 }
 0x101   :  { %2475 = vmatpush1.bf16.msra.mxu0 %v4629_v25  ;;  %2506 = vmatprep.mubr.bf16.mxu0 %v5361_v54  ;;  %v4713_v25 = vld [vmem:[#allocation2 + $0x3f0] ss:$20 sps:$4 sm:$0xff]  }
 0x102   :  { %2434 = vmatpush1.bf16.msra.mxu1 %v4626_v24  ;;  %2476 = vmatprep.subr.bf16.mxu0 %v4637_v27  ;;  %v4710_v24 = vld [vmem:[#allocation2 + $0x148] ss:$20 sps:$4 sm:$0xff]   ;;  %v4721_v27 = vld [vmem:[#allocation2 + $0x624] ss:$20 sps:$4 sm:$0xff]  }
 0x103   :  { %2435 = vmatprep.subr.bf16.mxu1 %v4634_v26  ;;  %v4718_v26 = vld [vmem:[#allocation2 + $0x3cc] ss:$20 sps:$4 sm:$0xff]  }
 0x105   :  { %2477 = vmatpush1.bf16.msra.mxu0 %v4635_v29  ;;  %v4719_v29 = vld [vmem:[#allocation2 + $0x620] ss:$20 sps:$4 sm:$0xff]  }
 0x106   :  { %2436 = vmatpush1.bf16.msra.mxu1 %v4632_v28  ;;  %2478 = vmatprep.subr.bf16.mxu0 %v4643_v31  ;;  %v4716_v28 = vld [vmem:[#allocation2 + $0x3c8] ss:$20 sps:$4 sm:$0xff]   ;;  %v4727_v31 = vld [vmem:[#allocation2 + $0x8a4] ss:$20 sps:$4 sm:$0xff]  }
 0x107   :  { %2437 = vmatprep.subr.bf16.mxu1 %v4640_v30  ;;  %v4724_v30 = vld [vmem:[#allocation2 + $0x5fc] ss:$20 sps:$4 sm:$0xff]  }
 0x109   :  { %2479 = vmatpush1.bf16.msra.mxu0 %v4641_v33  ;;  %v4725_v33 = vld [vmem:[#allocation2 + $0x8a0] ss:$20 sps:$4 sm:$0xff]  }
 0x10a   :  { %2438 = vmatpush1.bf16.msra.mxu1 %v4638_v32  ;;  %2480 = vmatprep.subr.bf16.mxu0 %v4649_v36  ;;  %v4722_v32 = vld [vmem:[#allocation2 + $0x5f8] ss:$20 sps:$4 sm:$0xff]   ;;  %v4733_v36 = vld [vmem:[#allocation2 + $0x87c] ss:$20 sps:$4 sm:$0xff]  }
 0x10b   :  { %2439 = vmatprep.subr.bf16.mxu1 %v4646_v34  ;;  %v4730_v34 = vld [vmem:[#allocation2 + $0x5d4] ss:$20 sps:$4 sm:$0xff]  }
 0x10d   :  { %2481 = vmatpush1.bf16.msra.mxu0 %v4647_v38  ;;  %v4731_v38 = vld [vmem:[#allocation2 + $0x878] ss:$20 sps:$4 sm:$0xff]  }
 0x10e   :  { %2440 = vmatpush1.bf16.msra.mxu1 %v4644_v37  ;;  %2482 = vmatprep.subr.bf16.mxu0 %v4655_v41  ;;  %v4728_v37 = vld [vmem:[#allocation2 + $0x5d0] ss:$20 sps:$4 sm:$0xff]   ;;  %v4739_v41 = vld [vmem:[#allocation2 + $0x854] ss:$20 sps:$4 sm:$0xff]  }
 0x10f   :  { %2441 = vmatprep.subr.bf16.mxu1 %v4652_v39  ;;  %v4736_v39 = vld [vmem:[#allocation2 + $0x5ac] ss:$20 sps:$4 sm:$0xff]  }
 0x111   :  { %2483 = vmatpush1.bf16.msra.mxu0 %v4653_v43  ;;  %v4737_v43 = vld [vmem:[#allocation2 + $0x850] ss:$20 sps:$4 sm:$0xff]  }
 0x112   :  { %2442 = vmatpush1.bf16.msra.mxu1 %v4650_v42  ;;  %2484 = vmatprep.subr.bf16.mxu0 %v4661_v45  ;;  %v4734_v42 = vld [vmem:[#allocation2 + $0x5a8] ss:$20 sps:$4 sm:$0xff]   ;;  %v4745_v45 = vld [vmem:[#allocation2 + $0x82c] ss:$20 sps:$4 sm:$0xff]  }
 0x113   :  { %2443 = vmatprep.subr.bf16.mxu1 %v4658_v44  ;;  %v4742_v44 = vld [vmem:[#allocation2 + $0x584] ss:$20 sps:$4 sm:$0xff]  }
 0x115   :  { %2485 = vmatpush1.bf16.msra.mxu0 %v4659_v47  ;;  %v4743_v47 = vld [vmem:[#allocation2 + $0x828] ss:$20 sps:$4 sm:$0xff]  }
 0x116   :  { %2444 = vmatpush1.bf16.msra.mxu1 %v4656_v46  ;;  %2486 = vmatprep.subr.bf16.mxu0 %v4667_v49  ;;  %v4740_v46 = vld [vmem:[#allocation2 + $0x580] ss:$20 sps:$4 sm:$0xff]   ;;  %v4751_v49 = vld [vmem:[#allocation2 + $0x804] ss:$20 sps:$4 sm:$0xff]  }
 0x117   :  { %2445 = vmatprep.subr.bf16.mxu1 %v4664_v48  ;;  %v4748_v48 = vld [vmem:[#allocation2 + $0x55c] ss:$20 sps:$4 sm:$0xff]  }
 0x119   :  { %2487 = vmatpush1.bf16.msra.mxu0 %v4665_v51  ;;  %v4749_v51 = vld [vmem:[#allocation2 + $0x800] ss:$20 sps:$4 sm:$0xff]  }
 0x11a   :  { %2446 = vmatpush1.bf16.msra.mxu1 %v4662_v50  ;;  %2488 = vmatprep.subr.bf16.mxu0 %v4673_v55  ;;  %v4746_v50 = vld [vmem:[#allocation2 + $0x558] ss:$20 sps:$4 sm:$0xff]   ;;  %v4757_v55 = vld [vmem:[#allocation2 + $0x7dc] ss:$20 sps:$4 sm:$0xff]  }
 0x11b   :  { %2447 = vmatprep.subr.bf16.mxu1 %v4670_v52  ;;  %v4754_v52 = vld [vmem:[#allocation2 + $0x534] ss:$20 sps:$4 sm:$0xff]  }
 0x11d   :  { %2489 = vmatpush1.bf16.msra.mxu0 %v4671_v57  ;;  %v4755_v57 = vld [vmem:[#allocation2 + $0x7d8] ss:$20 sps:$4 sm:$0xff]  }
 0x11e   :  { %2448 = vmatpush2.bf16.msra.mxu1 %v4668_v56  ;;  %2490 = vmatprep.subr.bf16.mxu0 %v4679_v59  ;;  %v4752_v56 = vld [vmem:[#allocation2 + $0x530] ss:$20 sps:$4 sm:$0xff]   ;;  %v4763_v59 = vld [vmem:[#allocation2 + $0x7b4] ss:$20 sps:$4 sm:$0xff]  }
 0x11f   :  { %2449 = vmatprep.subr.bf16.mxu1 %v4676_v58  ;;  %v4760_v58 = vld [vmem:[#allocation2 + $0x50c] ss:$20 sps:$4 sm:$0xff]  }
 0x121   :  { %2491 = vmatpush2.bf16.msra.mxu0 %v4677_v61  ;;  %v4761_v61 = vld [vmem:[#allocation2 + $0x7b0] ss:$20 sps:$4 sm:$0xff]  }
 0x122   :  { %2450 = vmatpush2.bf16.msra.mxu1 %v4674_v60  ;;  %2492 = vmatprep.subr.bf16.mxu0 %v4685_v63  ;;  %v4758_v60 = vld [vmem:[#allocation2 + $0x508] ss:$20 sps:$4 sm:$0xff]   ;;  %v4769_v63 = vld [vmem:[#allocation2 + $0x78c] ss:$20 sps:$4 sm:$0xff]  }
 0x123   :  { %2451 = vmatprep.subr.bf16.mxu1 %v4682_v62  ;;  %v4766_v62 = vld [vmem:[#allocation2 + $0x764] ss:$20 sps:$4 sm:$0xff]  }
 0x125   :  { %2493 = vmatpush2.bf16.msra.mxu0 %v4683_v1  ;;  %v4764_v1 = vld [vmem:[#allocation2 + $0x760] ss:$20 sps:$4 sm:$0xff]  }
 0x126   :  { %2452 = vmatpush2.bf16.msra.mxu1 %v4680_v0  ;;  %2494 = vmatprep.subr.bf16.mxu0 %v4691_v3  ;;  %v546_v0 = vld [vmem:[#allocation2 + $0x9b8] sm:$0xff] }
 0x127   :  { %2453 = vmatprep.subr.bf16.mxu1 %v4688_v2  ;;  %v4767_v2 = vld [vmem:[#allocation2 + $0x788] ss:$20 sps:$4 sm:$0xff]  }
 0x128   :  { %v4772_v3 = vld [vmem:[#allocation2 + $0x73c] ss:$20 sps:$4 sm:$0xff]  }
 0x129   :  { %2495 = vmatpush2.bf16.msra.mxu0 %v4689_v5  ;;  %v4147_v5 = vcombine.low %v546_v0, %v546_v0 }
 0x12a   :  { %2454 = vmatpush2.bf16.msra.mxu1 %v4686_v4  ;;  %2496 = vmatprep.subr.bf16.mxu0 %v4697_v7  ;;  %v4148_v4 = vcombine.high %v546_v0, %v546_v0  ;;  %v4777_v7 = vld [vmem:[#allocation2 + $0x714] ss:$20 sps:$4 sm:$0xff]   ;;  %v4837_v0 = vld [vmem:[#allocation2 + $0x38] ss:$20 sps:$4 sm:$0xff]  }
 0x12b   :  { %2455 = vmatprep.subr.bf16.mxu1 %v4694_v6  ;;  %v4770_v6 = vld [vmem:[#allocation2 + $0x738] ss:$20 sps:$4 sm:$0xff]  }
 0x12d   :  { %2497 = vmatpush2.bf16.msra.mxu0 %v4695_v11  ;;  %v4780_v11 = vld [vmem:[#allocation2 + $0x994] ss:$20 sps:$4 sm:$0xff]  }
 0x12e   :  { %2456 = vmatpush2.bf16.msra.mxu1 %v4692_v10  ;;  %2498 = vmatprep.subr.bf16.mxu0 %v4703_v13  ;;  %v2251_v10 = vsel %vm2243_vm1, %v4147_v5, 0  ;;  %v4778_v13 = vld [vmem:[#allocation2 + $0x990] ss:$20 sps:$4 sm:$0xff]  }
 0x12f   :  { %2457 = vmatprep.subr.bf16.mxu1 %v4700_v12  ;;  %v4775_v12 = vld [vmem:[#allocation2 + $0x710] ss:$20 sps:$4 sm:$0xff]  }
 0x130   :  { %v4842_v5 = vld [vmem:[#allocation2 + $0x290] ss:$20 sps:$4 sm:$0xff]  }
 0x131   :  { %2499 = vmatpush2.bf16.msra.mxu0 %v4701_v15  ;;  %v4786_v15 = vld [vmem:[#allocation2 + $0x96c] ss:$20 sps:$4 sm:$0xff]  }
 0x132   :  { %2458 = vmatpush2.bf16.msra.mxu1 %v4698_v14  ;;  %2500 = vmatprep.subr.bf16.mxu0 %v4709_v17  ;;  %v4783_v14 = vld [vmem:[#allocation2 + $0x6ec] ss:$20 sps:$4 sm:$0xff]   ;;  %v4784_v17 = vld [vmem:[#allocation2 + $0x968] ss:$20 sps:$4 sm:$0xff]  }
 0x133   :  { %2459 = vmatprep.subr.bf16.mxu1 %v4706_v16  ;;  %v4781_v16 = vld [vmem:[#allocation2 + $0x6e8] ss:$20 sps:$4 sm:$0xff]  }
 0x135   :  { %2501 = vmatpush2.bf16.msra.mxu0 %v4707_v20  ;;  %v4792_v20 = vld [vmem:[#allocation2 + $0x944] ss:$20 sps:$4 sm:$0xff]  }
 0x136   :  { %2460 = vmatpush2.bf16.msra.mxu1 %v4704_v18  ;;  %2502 = vmatprep.subr.bf16.mxu0 %v4715_v22  ;;  %v4789_v18 = vld [vmem:[#allocation2 + $0x6c4] ss:$20 sps:$4 sm:$0xff]   ;;  %v4790_v22 = vld [vmem:[#allocation2 + $0x940] ss:$20 sps:$4 sm:$0xff]  }
 0x137   :  { %2461 = vmatprep.subr.bf16.mxu1 %v4712_v21  ;;  %v4787_v21 = vld [vmem:[#allocation2 + $0x6c0] ss:$20 sps:$4 sm:$0xff]  }
 0x139   :  { %2503 = vmatpush2.bf16.msra.mxu0 %v4713_v25  ;;  %v4798_v25 = vld [vmem:[#allocation2 + $0x91c] ss:$20 sps:$4 sm:$0xff]  }
 0x13a   :  { %2462 = vmatpush2.bf16.msra.mxu1 %v4710_v24  ;;  %2504 = vmatprep.subr.bf16.mxu0 %v4718_v26  ;;  %v4795_v24 = vld [vmem:[#allocation2 + $0x69c] ss:$20 sps:$4 sm:$0xff]   ;;  %v4793_v26 = vld [vmem:[#allocation2 + $0x698] ss:$20 sps:$4 sm:$0xff]  }
 0x13b   :  { %2517 = vmatprep.subr.bf16.mxu1 %v4721_v27  ;;  %v4796_v27 = vld [vmem:[#allocation2 + $0x918] ss:$20 sps:$4 sm:$0xff]  }
 0x13d   :  { %2464 = vmatmul.mubr.bf16.vlgmr.msra.gmra.mxu1 %v5365_v8  ;;  %2505 = vmatpush2.bf16.msra.mxu0 %v4716_v28  ;;  %v4801_v28 = vld [vmem:[#allocation2 + $0x674] ss:$20 sps:$4 sm:$0xff]  }
 0x13e   :  { %2518 = vmatpush1.bf16.msra.mxu1 %v4719_v29  ;;  %2560 = vmatprep.subr.bf16.mxu0 %v4727_v31  ;;  %v4804_v29 = vld [vmem:[#allocation2 + $0x8f4] ss:$20 sps:$4 sm:$0xff]   ;;  %v4802_v31 = vld [vmem:[#allocation2 + $0x8f0] ss:$20 sps:$4 sm:$0xff]  }
 0x13f   :  { %2519 = vmatprep.subr.bf16.mxu1 %v4724_v30  ;;  %2549 = vmatprep.mubr.bf16.mxu1 %v5399_v40  ;;  %v4799_v30 = vld [vmem:[#allocation2 + $0x670] ss:$20 sps:$4 sm:$0xff]  }
 0x140   :  { %2507 = vmatmul.mubr.bf16.vlgmr.msra.gmra.mxu0 %v5367_v9 }
 0x141   :  { %2561 = vmatpush1.bf16.msra.mxu0 %v4725_v33  ;;  %4153 = vmatprep.mubr.msk.bf16.mxu0 %vm2239_vm0, %v5383_v35  ;;  %v4810_v33 = vld [vmem:[#allocation2 + $0x8cc] ss:$20 sps:$4 sm:$0xff]  }
 0x142   :  { %2520 = vmatpush1.bf16.msra.mxu1 %v4722_v32  ;;  %2562 = vmatprep.subr.bf16.mxu0 %v4733_v36  ;;  %v4807_v32 = vld [vmem:[#allocation2 + $0x64c] ss:$20 sps:$4 sm:$0xff]   ;;  %v4808_v36 = vld [vmem:[#allocation2 + $0x8c8] ss:$20 sps:$4 sm:$0xff]  }
 0x143   :  { %2521 = vmatprep.subr.bf16.mxu1 %v4730_v34  ;;  %v4805_v34 = vld [vmem:[#allocation2 + $0x648] ss:$20 sps:$4 sm:$0xff]  }
 0x145   :  { %2563 = vmatpush1.bf16.msra.mxu0 %v4731_v38  ;;  %v4812_v38 = vld [vmem:[#allocation2 + $0x4e8] ss:$20 sps:$4 sm:$0xff]  }
 0x146   :  { %2522 = vmatpush1.bf16.msra.mxu1 %v4728_v37  ;;  %2564 = vmatprep.subr.bf16.mxu0 %v4739_v41  ;;  %v4811_v37 = vld [vmem:[#allocation2 + $0x268] ss:$20 sps:$4 sm:$0xff]  }
 0x147   :  { %2523 = vmatprep.subr.bf16.mxu1 %v4736_v39  ;;  %v4813_v39 = vld [vmem:[#allocation2 + $0x128] ss:$20 sps:$4 sm:$0xff]  }
 0x148   :  { %v4814_v41 = vld [vmem:[#allocation2 + $0x3a8] ss:$20 sps:$4 sm:$0xff]  }
 0x149   :  { %2565 = vmatpush1.bf16.msra.mxu0 %v4737_v43  ;;  %v4816_v43 = vld [vmem:[#allocation2 + $0x4c0] ss:$20 sps:$4 sm:$0xff]  }
 0x14a   :  { %2524 = vmatpush1.bf16.msra.mxu1 %v4734_v42  ;;  %2566 = vmatprep.subr.bf16.mxu0 %v4745_v45  ;;  %v4815_v42 = vld [vmem:[#allocation2 + $0x240] ss:$20 sps:$4 sm:$0xff]  }
 0x14b   :  { %2525 = vmatprep.subr.bf16.mxu1 %v4742_v44  ;;  %v4817_v44 = vld [vmem:[#allocation2 + $0x100] ss:$20 sps:$4 sm:$0xff]  }
 0x14c   :  { %v4818_v45 = vld [vmem:[#allocation2 + $0x380] ss:$20 sps:$4 sm:$0xff]  }
 0x14d   :  { %2567 = vmatpush1.bf16.msra.mxu0 %v4743_v47  ;;  %v4820_v47 = vld [vmem:[#allocation2 + $0x498] ss:$20 sps:$4 sm:$0xff]  }
 0x14e   :  { %2526 = vmatpush1.bf16.msra.mxu1 %v4740_v46  ;;  %2568 = vmatprep.subr.bf16.mxu0 %v4751_v49  ;;  %v4819_v46 = vld [vmem:[#allocation2 + $0x218] ss:$20 sps:$4 sm:$0xff]  }
 0x14f   :  { %2527 = vmatprep.subr.bf16.mxu1 %v4748_v48  ;;  %v4821_v48 = vld [vmem:[#allocation2 + $0xd8] ss:$20 sps:$4 sm:$0xff]  }
 0x150   :  { %v4822_v49 = vld [vmem:[#allocation2 + $0x358] ss:$20 sps:$4 sm:$0xff]  }
 0x151   :  { %2569 = vmatpush1.bf16.msra.mxu0 %v4749_v51  ;;  %v4824_v51 = vld [vmem:[#allocation2 + $0x470] ss:$20 sps:$4 sm:$0xff]  }
 0x152   :  { %2528 = vmatpush1.bf16.msra.mxu1 %v4746_v50  ;;  %2570 = vmatprep.subr.bf16.mxu0 %v4757_v55  ;;  %v4823_v50 = vld [vmem:[#allocation2 + $0x1f0] ss:$20 sps:$4 sm:$0xff]  }
 0x153   :  { %2529 = vmatprep.subr.bf16.mxu1 %v4754_v52  ;;  %v4825_v52 = vld [vmem:[#allocation2 + $0xb0] ss:$20 sps:$4 sm:$0xff]  }
 0x154   :  { %v4826_v55 = vld [vmem:[#allocation2 + $0x330] ss:$20 sps:$4 sm:$0xff]  }
 0x155   :  { %2571 = vmatpush1.bf16.msra.mxu0 %v4755_v57  ;;  %v4828_v57 = vld [vmem:[#allocation2 + $0x448] ss:$20 sps:$4 sm:$0xff]  }
 0x156   :  { %2530 = vmatpush1.bf16.msra.mxu1 %v4752_v56  ;;  %2572 = vmatprep.subr.bf16.mxu0 %v4763_v59  ;;  %v4827_v56 = vld [vmem:[#allocation2 + $0x1c8] ss:$20 sps:$4 sm:$0xff]   ;;  %v4832_v59 = vld [vmem:[#allocation2 + $0x420] ss:$20 sps:$4 sm:$0xff]  }
 0x157   :  { %2531 = vmatprep.subr.bf16.mxu1 %v4760_v58  ;;  %v4829_v58 = vld [vmem:[#allocation2 + $0x88] ss:$20 sps:$4 sm:$0xff]  }
 0x159   :  { %2573 = vmatpush1.bf16.msra.mxu0 %v4761_v61  ;;  %v4834_v61 = vld [vmem:[#allocation2 + $0x2e0] ss:$20 sps:$4 sm:$0xff]  }
 0x15a   :  { %2532 = vmatpush1.bf16.msra.mxu1 %v4758_v60  ;;  %2574 = vmatprep.subr.bf16.mxu0 %v4769_v63  ;;  %v4833_v60 = vld [vmem:[#allocation2 + $0x60] ss:$20 sps:$4 sm:$0xff]   ;;  %v4836_v63 = vld [vmem:[#allocation2 + $0x3f8] ss:$20 sps:$4 sm:$0xff]  }
 0x15b   :  { %2533 = vmatprep.subr.bf16.mxu1 %v4766_v62  ;;  %v4835_v62 = vld [vmem:[#allocation2 + $0x178] ss:$20 sps:$4 sm:$0xff]  }
 0x15d   :  { %2575 = vmatpush1.bf16.msra.mxu0 %v4767_v2  ;;  %v4839_v2 = vld [vmem:[#allocation2 + $0x150] ss:$20 sps:$4 sm:$0xff]  }
 0x15e   :  { %2534 = vmatpush2.bf16.msra.mxu1 %v4764_v1  ;;  %4152 = vmatprep.subr.msk.bf16.mxu0 %vm2243_vm1, %v4148_v4  ;;  %v4838_v1 = vld [vmem:[#allocation2 + $0x2b8] ss:$20 sps:$4 sm:$0xff]   ;;  %v4841_v4 = vld [vmem:[#allocation2 + $0x10] ss:$20 sps:$4 sm:$0xff]  }
 0x15f   :  { %2535 = vmatprep.subr.bf16.mxu1 %v4772_v3  ;;  %v4840_v3 = vld [vmem:[#allocation2 + $0x3d0] ss:$20 sps:$4 sm:$0xff]  }
 0x161   :  { %2579 = vmatpush2.bf16.msra.mxu0 %v2251_v10  ;;  %v4845_v10 = vld [vmem:[#allocation2 + $0x8a8] ss:$20 sps:$4 sm:$0xff]  }
 0x162   :  { %2536 = vmatpush2.bf16.msra.mxu1 %v4770_v6  ;;  %2580 = vmatprep.subr.bf16.mxu0 %v4780_v11  ;;  %v4843_v6 = vld [vmem:[#allocation2 + $0x768] ss:$20 sps:$4 sm:$0xff]   ;;  %v4846_v11 = vld [vmem:[#allocation2 + $0x740] ss:$20 sps:$4 sm:$0xff]  }
 0x163   :  { %2537 = vmatprep.subr.bf16.mxu1 %v4777_v7  ;;  %v4844_v7 = vld [vmem:[#allocation2 + $0x628] ss:$20 sps:$4 sm:$0xff]  }
 0x165   :  { %2581 = vmatpush2.bf16.msra.mxu0 %v4778_v13  ;;  %v4847_v13 = vld [vmem:[#allocation2 + $0x600] ss:$20 sps:$4 sm:$0xff]  }
 0x166   :  { %2538 = vmatpush2.bf16.msra.mxu1 %v4775_v12  ;;  %2582 = vmatprep.subr.bf16.mxu0 %v4786_v15  ;;  %v5254_v12 = vmov 0   ;;  %v4849_v15 = vld [vmem:[#allocation2 + $0x718] ss:$20 sps:$4 sm:$0xff]  }
 0x167   :  { %2539 = vmatprep.subr.bf16.mxu1 %v4783_v14  ;;  %v4848_v14 = vld [vmem:[#allocation2 + $0x880] ss:$20 sps:$4 sm:$0xff]  }
 0x169   :  { %2583 = vmatpush2.bf16.msra.mxu0 %v4784_v17  ;;  %v4851_v17 = vld [vmem:[#allocation2 + $0x858] ss:$20 sps:$4 sm:$0xff]  }
 0x16a   :  { %2540 = vmatpush2.bf16.msra.mxu1 %v4781_v16  ;;  %2584 = vmatprep.subr.bf16.mxu0 %v4792_v20  ;;  %v4850_v16 = vld [vmem:[#allocation2 + $0x5d8] ss:$20 sps:$4 sm:$0xff]   ;;  %v4855_v20 = vld [vmem:[#allocation2 + $0x6c8] ss:$20 sps:$4 sm:$0xff]  }
 0x16b   :  { %2541 = vmatprep.subr.bf16.mxu1 %v4789_v18  ;;  %v4852_v18 = vld [vmem:[#allocation2 + $0x6f0] ss:$20 sps:$4 sm:$0xff]  }
 0x16d   :  { %2585 = vmatpush2.bf16.msra.mxu0 %v4790_v22  ;;  %v4859_v22 = vld [vmem:[#allocation2 + $0x560] ss:$20 sps:$4 sm:$0xff]  }
 0x16e   :  { %2542 = vmatpush2.bf16.msra.mxu1 %v4787_v21  ;;  %2586 = vmatprep.subr.bf16.mxu0 %v4798_v25  ;;  %v4857_v21 = vld [vmem:[#allocation2 + $0x808] ss:$20 sps:$4 sm:$0xff]  }
 0x16f   :  { %2543 = vmatprep.subr.bf16.mxu1 %v4795_v24  ;;  %v4860_v24 = vld [vmem:[#allocation2 + $0x7e0] ss:$20 sps:$4 sm:$0xff]  }
 0x171   :  { %2587 = vmatpush2.bf16.msra.mxu0 %v4796_v27  ;;  %v550_v27 = vlaneseq }
 0x172   :  { %2544 = vmatpush2.bf16.msra.mxu1 %v4793_v26  ;;  %2588 = vmatprep.subr.bf16.mxu0 %v4804_v29  ;;  %v4861_v26 = vld [vmem:[#allocation2 + $0x678] ss:$20 sps:$4 sm:$0xff]  }
 0x173   :  { %2545 = vmatprep.subr.bf16.mxu1 %v4801_v28  ;;  %v4862_v28 = vld [vmem:[#allocation2 + $0x538] ss:$20 sps:$4 sm:$0xff]  }
 0x174   :  { %v4863_v29 = vld [vmem:[#allocation2 + $0x7b8] ss:$20 sps:$4 sm:$0xff]  }
 0x175   :  { %2589 = vmatpush2.bf16.msra.mxu0 %v4802_v31 }
 0x176   :  { %2546 = vmatpush2.bf16.msra.mxu1 %v4799_v30  ;;  %2590 = vmatprep.subr.bf16.mxu0 %v4810_v33  ;;  %v5443_v33 = vshrl.u32 %v550_v27, 7  ;;  %v4922_v27 = vld [vmem:[#allocation6 + $0x170] ss:$8 sps:$4 sm:$0xff]  }
 0x177   :  { %2547 = vmatprep.subr.bf16.mxu1 %v4807_v32  ;;  %v4864_v32 = vld [vmem:[#allocation2 + $0x650] ss:$20 sps:$4 sm:$0xff]  }
 0x179   :  { %2591 = vmatpush2.bf16.msra.mxu0 %v4808_v36  ;;  %v4865_v36 = vld [vmem:[#allocation2 + $0x510] ss:$20 sps:$4 sm:$0xff]  }
 0x17a   :  { %2548 = vmatpush2.bf16.msra.mxu1 %v4805_v34  ;;  %4270 = vmatprep.subr.bf16.mxu0 %v4811_v37  ;;  %v556_v34 = vsub.s32 1, %v5443_v33  ;;  %v4866_v37 = vld [vmem:[#allocation2 + $0x790] ss:$20 sps:$4 sm:$0xff]  }
 0x17b   :  { %4292 = vmatprep.subr.bf16.mxu1 %v4812_v38 }
 0x17c   :  { %2593 = vmatmul.mubr.bf16.vlgmr.msra.gmra.mxu0 %v5406_v19 }
 0x17d   :  { %2550 = vmatmul.mubr.bf16.vlgmr.msra.gmra.mxu1 %v5411_v23  ;;  %4271 = vmatpush3.bf16.msra.mxu0 %v4813_v39 }
 0x17e   :  { %4293 = vmatpush3.bf16.msra.mxu1 %v4814_v41  ;;  %4272 = vmatprep.subr.bf16.mxu0 %v4815_v42  ;;  %v4869_v41 = vld [vmem:[#allocation6 + $0x74] ss:$8 sps:$4 sm:$0xff]  }
 0x17f   :  { %4294 = vmatprep.subr.bf16.mxu1 %v4816_v43  ;;  %2635 = vmatprep.mubr.bf16.mxu0 %v5359_v53  ;;  %v4830_v53 = vld [vmem:[#allocation2 + $0x308] ss:$20 sps:$4 sm:$0xff]   ;;  %v4870_v42 = vld [vmem:[#allocation2 + $0x9c0] ss:$0 sps:$4 sm:$0xff]  }
 0x180   :  { %2676 = vmatprep.mubr.bf16.mxu1 %v5361_v54  ;;  %v4831_v54 = vld [vmem:[#allocation2 + $0x1a0] ss:$20 sps:$4 sm:$0xff]   ;;  %v5440_v30 = vpop.f32.mrf.mxu0  ;;  %v5449_v43 = vld [vmem:[#allocation4] sm:$0x1f] }
 0x181   :  { %4273 = vmatpush3.bf16.msra.mxu0 %v4817_v44  ;;  %v5437_v25 = vpop.f32.mrf.mxu1  ;;  %v557_v44 = vrot.slane %v5449_v43, %v556_v34 }
 0x182   :  { %4295 = vmatpush3.bf16.msra.mxu1 %v4818_v45  ;;  %4274 = vmatprep.subr.bf16.mxu0 %v4819_v46  ;;  %v2295_v38 = vpop.f32.mrf.mxu0  ;;  %v4867_v45 = vld [vmem:[#allocation6 + $0x70] ss:$8 sps:$4 sm:$0xff]  }
 0x183   :  { %4296 = vmatprep.subr.bf16.mxu1 %v4820_v47  ;;  %v2338_v31 = vpop.f32.mrf.mxu1 }
 0x184   :  { %v5454_v46 = vpop.f32.mrf.mxu0 }
 0x185   :  { %4275 = vmatpush3.bf16.msra.mxu0 %v4821_v48  ;;  %v5446_v39 = vpop.f32.mrf.mxu1  ;;  %v2257_v48 = vsel %vm2243_vm1, %v4870_v42, 0  ;;  %v4906_v42 = vld [vmem:[#allocation6 + $0xd4] ss:$8 sps:$4 sm:$0xff]  }
 0x186   :  { %4297 = vmatpush3.bf16.msra.mxu1 %v4822_v49  ;;  %4276 = vmatprep.subr.bf16.mxu0 %v4823_v50  ;;  %v4873_v49 = vld [vmem:[#allocation6 + $0x64] ss:$8 sps:$4 sm:$0xff]  }
 0x187   :  { %4298 = vmatprep.subr.bf16.mxu1 %v4824_v51  ;;  %v2342_v47 = vpop.f32.mrf.mxu1  ;;  %v2296_v51 = vadd.f32 %v2295_v38, %v557_v44  ;;  %v4901_v38 = vld [vmem:[#allocation6 + $0xe0] ss:$8 sps:$4 sm:$0xff]  }
 0x189   :  { %4277 = vmatpush3.bf16.msra.mxu0 %v4825_v52  ;;  %v4871_v52 = vld [vmem:[#allocation6 + $0x60] ss:$8 sps:$4 sm:$0xff]  }
 0x18a   :  { %4299 = vmatpush3.bf16.msra.mxu1 %v4826_v55  ;;  %4278 = vmatprep.subr.bf16.mxu0 %v4827_v56  ;;  %v4874_v55 = vld [vmem:[#allocation2 + $0x998] ss:$20 sps:$4 sm:$0xff]   ;;  %v2299_v56 = vpop.f32.mrf.mxu0 }
 0x18b   :  { %4300 = vmatprep.subr.bf16.mxu1 %v4828_v57  ;;  %v4877_v57 = vld [vmem:[#allocation6 + $0x54] ss:$8 sps:$4 sm:$0xff]  }
 0x18d   :  { %4279 = vmatpush3.bf16.msra.mxu0 %v4829_v58 }
 0x18e   :  { %4301 = vmatpush3.bf16.msra.mxu1 %v4830_v53  ;;  %4280 = vmatprep.subr.bf16.mxu0 %v4831_v54  ;;  %v2339_v54 = vadd.f32 %v2338_v31, %v2296_v51  ;;  %v4898_v31 = vld [vmem:[#allocation6 + $0xf0] ss:$8 sps:$4 sm:$0xff]   ;;  %v4907_v51 = vld [vmem:[#allocation6 + $0xc0] ss:$8 sps:$4 sm:$0xff]  }
 0x18f   :  { %4302 = vmatprep.subr.bf16.mxu1 %v4832_v59  ;;  %v2300_v59 = vadd.f32 %v2299_v56, %v557_v44  ;;  %v4933_v44 = vld [vmem:[#allocation6 + $0x144] ss:$8 sps:$4 sm:$0xff]   ;;  %v4912_v56 = vld [vmem:[#allocation6 + $0xb4] ss:$8 sps:$4 sm:$0xff]  }
 0x191   :  { %4281 = vmatpush3.bf16.msra.mxu0 %v4833_v60  ;;  %v4875_v60 = vld [vmem:[#allocation6 + $0x50] ss:$8 sps:$4 sm:$0xff]  }
 0x192   :  { %4303 = vmatpush3.bf16.msra.mxu1 %v4834_v61  ;;  %4282 = vmatprep.subr.bf16.mxu0 %v4835_v62  ;;  %v4878_v61 = vld [vmem:[#allocation2 + $0x970] ss:$20 sps:$4 sm:$0xff]  }
 0x193   :  { %4304 = vmatprep.subr.bf16.mxu1 %v4836_v63  ;;  %v4881_v62 = vld [vmem:[#allocation6 + $0x44] ss:$8 sps:$4 sm:$0xff]  }
 0x195   :  { %4283 = vmatpush3.bf16.msra.mxu0 %v4837_v0 }
 0x196   :  { %4305 = vmatpush3.bf16.msra.mxu1 %v4838_v1  ;;  %4284 = vmatprep.subr.bf16.mxu0 %v4839_v2  ;;  %v2343_v2 = vadd.f32 %v2342_v47, %v2300_v59  ;;  %v552_v47 = vsub.s32 0, %v5443_v33  ;;  %v4937_v59 = vld [vmem:[#allocation6 + $0x120] ss:$8 sps:$4 sm:$0xff]  }
 0x197   :  { %4306 = vmatprep.subr.bf16.mxu1 %v4840_v3  ;;  %v4879_v3 = vld [vmem:[#allocation6 + $0x40] ss:$8 sps:$4 sm:$0xff]  }
 0x199   :  { %4285 = vmatpush3.bf16.msra.mxu0 %v4841_v4  ;;  %v4882_v4 = vld [vmem:[#allocation2 + $0x948] ss:$20 sps:$4 sm:$0xff]  }
 0x19a   :  { %4307 = vmatpush3.bf16.msra.mxu1 %v4842_v5  ;;  %4314 = vmatprep.subr.bf16.mxu0 %v4843_v6  ;;  %v4885_v6 = vld [vmem:[#allocation6 + $0x34] ss:$8 sps:$4 sm:$0xff]  }
 0x19b   :  { %2726 = vmatprep.subr.bf16.mxu1 %v5254_v12 }
 0x19c   :  { %2636 = vmatmul.mubr.bf16.vlgmr.msra.gmra.mxu0 %v5365_v8  ;;  %v4853_v8 = vld [vmem:[#allocation2 + $0x5b0] ss:$20 sps:$4 sm:$0xff]  }
 0x19d   :  { %2677 = vmatmul.mubr.bf16.vlgmr.msra.gmra.mxu1 %v5367_v9  ;;  %4315 = vmatpush3.bf16.msra.mxu0 %v4844_v7  ;;  %v4854_v9 = vld [vmem:[#allocation2 + $0x830] ss:$20 sps:$4 sm:$0xff]  }
 0x19e   :  { %2727 = vmatpush1.bf16.msra.mxu1 %v4845_v10  ;;  %4316 = vmatprep.subr.bf16.mxu0 %v4846_v11 }
 0x19f   :  { %2728 = vmatprep.subr.bf16.mxu1 %v5254_v12  ;;  %2717 = vmatprep.mubr.bf16.mxu0 %v5399_v40  ;;  %v4856_v40 = vld [vmem:[#allocation2 + $0x588] ss:$20 sps:$4 sm:$0xff]  }
 0x1a0   :  { %4154 = vmatprep.mubr.msk.bf16.mxu1 %vm2239_vm0, %v5383_v35  ;;  %v4858_v35 = vld [vmem:[#allocation2 + $0x6a0] ss:$20 sps:$4 sm:$0xff]  }
 0x1a1   :  { %4317 = vmatpush3.bf16.msra.mxu0 %v4847_v13 }
 0x1a2   :  { %2729 = vmatpush1.bf16.msra.mxu1 %v4848_v14  ;;  %4318 = vmatprep.subr.bf16.mxu0 %v4849_v15  ;;  %v4883_v14 = vld [vmem:[#allocation6 + $0x30] ss:$8 sps:$4 sm:$0xff]  }
 0x1a3   :  { %2730 = vmatprep.subr.bf16.mxu1 %v5254_v12  ;;  %v4886_v15 = vld [vmem:[#allocation2 + $0x920] ss:$20 sps:$4 sm:$0xff]  }
 0x1a5   :  { %4319 = vmatpush3.bf16.msra.mxu0 %v4850_v16  ;;  %v4889_v16 = vld [vmem:[#allocation6 + $0x24] ss:$8 sps:$4 sm:$0xff]  }
 0x1a6   :  { %2731 = vmatpush1.bf16.msra.mxu1 %v4851_v17  ;;  %4320 = vmatprep.subr.bf16.mxu0 %v4852_v18 }
 0x1a7   :  { %2732 = vmatprep.subr.bf16.mxu1 %v5254_v12 }
 0x1a9   :  { %4321 = vmatpush3.bf16.msra.mxu0 %v4853_v8 }
 0x1aa   :  { %2733 = vmatpush1.bf16.msra.mxu1 %v4854_v9  ;;  %4322 = vmatprep.subr.bf16.mxu0 %v4855_v20  ;;  %v4887_v9 = vld [vmem:[#allocation6 + $0x20] ss:$8 sps:$4 sm:$0xff]  }
 0x1ab   :  { %2734 = vmatprep.subr.bf16.mxu1 %v5254_v12  ;;  %v4890_v20 = vld [vmem:[#allocation2 + $0x8f8] ss:$20 sps:$4 sm:$0xff]  }
 0x1ad   :  { %4323 = vmatpush3.bf16.msra.mxu0 %v4856_v40  ;;  %v4893_v40 = vld [vmem:[#allocation6 + $0x14] ss:$8 sps:$4 sm:$0xff]  }
 0x1ae   :  { %2735 = vmatpush1.bf16.msra.mxu1 %v4857_v21  ;;  %4324 = vmatprep.subr.bf16.mxu0 %v4858_v35  ;;  %v4891_v21 = vld [vmem:[#allocation6 + $0x10] ss:$8 sps:$4 sm:$0xff]  }
 0x1af   :  { %2736 = vmatprep.subr.bf16.mxu1 %v5254_v12  ;;  %v4894_v35 = vld [vmem:[#allocation2 + $0x8d0] ss:$20 sps:$4 sm:$0xff]  }
 0x1b1   :  { %4325 = vmatpush3.bf16.msra.mxu0 %v4859_v22  ;;  %v4897_v22 = vld [vmem:[#allocation6 + $0x4] ss:$8 sps:$4 sm:$0xff]  }
 0x1b2   :  { %2737 = vmatpush1.bf16.msra.mxu1 %v4860_v24  ;;  %4326 = vmatprep.subr.bf16.mxu0 %v4861_v26  ;;  %v4924_v24 = vld [vmem:[#allocation6 + $0x174] ss:$8 sps:$4 sm:$0xff]   ;;  %v4895_v26 = vld [vmem:[#allocation6] ss:$8 sps:$4 sm:$0xff]  }
 0x1b3   :  { %2738 = vmatprep.subr.bf16.mxu1 %v5254_v12 }
 0x1b5   :  { %4327 = vmatpush3.bf16.msra.mxu0 %v4862_v28  ;;  %v4900_v28 = vld [vmem:[#allocation6 + $0xf4] ss:$8 sps:$4 sm:$0xff]  }
 0x1b6   :  { %2739 = vmatpush1.bf16.msra.mxu1 %v4863_v29  ;;  %4328 = vmatprep.subr.bf16.mxu0 %v4864_v32  ;;  %v4927_v29 = vld [vmem:[#allocation6 + $0x164] ss:$8 sps:$4 sm:$0xff]   ;;  %v4925_v32 = vld [vmem:[#allocation6 + $0x160] ss:$8 sps:$4 sm:$0xff]  }
 0x1b7   :  { %2740 = vmatprep.subr.bf16.mxu1 %v5254_v12 }
 0x1b9   :  { %4329 = vmatpush3.bf16.msra.mxu0 %v4865_v36  ;;  %v4903_v36 = vld [vmem:[#allocation6 + $0xe4] ss:$8 sps:$4 sm:$0xff]  }
 0x1ba   :  { %2741 = vmatpush1.bf16.msra.mxu1 %v4866_v37  ;;  %3274 = vmatprep.subr.bf16.mxu0 %v4869_v41  ;;  %v4930_v37 = vld [vmem:[#allocation6 + $0x154] ss:$8 sps:$4 sm:$0xff]   ;;  %v4928_v41 = vld [vmem:[#allocation6 + $0x150] ss:$8 sps:$4 sm:$0xff]  }
 0x1bb   :  { %2744 = vmatprep.subr.bf16.mxu1 %v5254_v12 }
 0x1bc   :  { %2718 = vmatmul.mubr.bf16.vlgmr.msra.gmra.mxu0 %v5411_v23 }
 0x1bd   :  { %v5458_v50 = vpop.f32.mrf.mxu1  ;;  %3275 = vmatpush1.bf16.msra.mxu0 %v4867_v45  ;;  %v4904_v45 = vld [vmem:[#allocation6 + $0xd0] ss:$8 sps:$4 sm:$0xff]  }
 0x1be   :  { %2745 = vmatpush2.bf16.msra.mxu1 %v2257_v48  ;;  %3276 = vmatprep.subr.bf16.mxu0 %v4873_v49  ;;  %v4909_v48 = vld [vmem:[#allocation6 + $0xc4] ss:$8 sps:$4 sm:$0xff]   ;;  %v4936_v49 = vld [vmem:[#allocation6 + $0x134] ss:$8 sps:$4 sm:$0xff]  }
 0x1bf   :  { %2746 = vmatprep.subr.bf16.mxu1 %v5254_v12  ;;  %v2424_v58 = vpop.f32.mrf.mxu1 }
 0x1c0   :  { %v5462_v53 = vpop.f32.mrf.mxu0 }
 0x1c1   :  { %3277 = vmatpush1.bf16.msra.mxu0 %v4871_v52  ;;  %v5465_v0 = vpop.f32.mrf.mxu1  ;;  %v4934_v52 = vld [vmem:[#allocation6 + $0x130] ss:$8 sps:$4 sm:$0xff]  }
 0x1c2   :  { %2747 = vmatpush2.bf16.msra.mxu1 %v4874_v55  ;;  %v2381_v23 = vpop.f32.mrf.mxu0  ;;  %3278 = vmatprep.subr.bf16.mxu0 %v4877_v57  ;;  %v553_v55 = vrot.slane %v5449_v43, %v552_v47  ;;  %v4939_v57 = vld [vmem:[#allocation6 + $0x124] ss:$8 sps:$4 sm:$0xff]  }
 0x1c3   :  { %2748 = vmatprep.subr.bf16.mxu1 %v5254_v12  ;;  %v2382_v63 = vadd.f32 %v2381_v23, %v2339_v54  ;;  %v2428_v11 = vpop.f32.mrf.mxu1  ;;  %v4910_v54 = vld [vmem:[#allocation6 + $0xb0] ss:$8 sps:$4 sm:$0xff]   ;;  %v4942_v23 = vld [vmem:[#allocation6 + $0x114] ss:$8 sps:$4 sm:$0xff]  }
 0x1c4   :  { %v5467_v1 = vpop.f32.mrf.mxu0 }
 0x1c5   :  { %3279 = vmatpush1.bf16.msra.mxu0 %v4875_v60  ;;  %v2425_v7 = vadd.f32 %v2424_v58, %v2382_v63  ;;  %v2298_v58 = vadd.f32 %v5454_v46, %v553_v55  ;;  %v2294_v60 = vadd.f32 %v5440_v30, %v553_v55  ;;  %v4913_v63 = vld [vmem:[#allocation6 + $0xa0] ss:$8 sps:$4 sm:$0xff]   ;;  %v560_v55 = vsub.s32 2, %v5443_v33 }
 0x1c6   :  { %2749 = vmatpush2.bf16.msra.mxu1 %v4878_v61  ;;  %v2385_v5 = vpop.f32.mrf.mxu0  ;;  %3280 = vmatprep.subr.bf16.mxu0 %v4881_v62  ;;  %v4915_v61 = vld [vmem:[#allocation6 + $0xa4] ss:$8 sps:$4 sm:$0xff]  }
 0x1c7   :  { %2750 = vmatprep.subr.bf16.mxu1 %v5254_v12  ;;  %v2386_v10 = vadd.f32 %v2385_v5, %v2343_v2  ;;  %v2768_v17 = vmax.f32 %v2425_v7, 0.0  ;;  %v2341_v62 = vadd.f32 %v5446_v39, %v2298_v58  ;;  %v4940_v2 = vld [vmem:[#allocation6 + $0x110] ss:$8 sps:$4 sm:$0xff]   ;;  %v4945_v5 = vld [vmem:[#allocation6 + $0x104] ss:$8 sps:$4 sm:$0xff]   ;;  %v564_v58 = vsub.s32 3, %v5443_v33 }
 0x1c8   :  { %v4943_v7 = vld [vmem:[#allocation6 + $0x100] ss:$8 sps:$4 sm:$0xff]  }
 0x1c9   :  { %v2429_v13 = vadd.f32 %v2428_v11, %v2386_v10  ;;  %3281 = vmatpush1.bf16.msra.mxu0 %v4879_v3  ;;  %v2337_v3 = vadd.f32 %v5437_v25, %v2294_v60  ;;  %v2384_v46 = vadd.f32 %v5467_v1, %v2341_v62  ;;  %v4921_v10 = vld [vmem:[#allocation6 + $0x84] ss:$8 sps:$4 sm:$0xff]   ;;  %v4948_v11 = vld [vmem:[#allocation6 + $0x1f4] ss:$8 sps:$4 sm:$0xff]   ;;  %v4919_v1 = vld [vmem:[#allocation6 + $0x80] ss:$8 sps:$4 sm:$0xff]  }
 0x1ca   :  { %2751 = vmatpush2.bf16.msra.mxu1 %v4882_v4  ;;  %3282 = vmatprep.subr.bf16.mxu0 %v4885_v6  ;;  %v4918_v4 = vld [vmem:[#allocation6 + $0x94] ss:$8 sps:$4 sm:$0xff]   ;;  %v4916_v6 = vld [vmem:[#allocation6 + $0x90] ss:$8 sps:$4 sm:$0xff]  }
 0x1cb   :  { %2752 = vmatprep.subr.bf16.mxu1 %v5254_v12  ;;  %v2773_v18 = vmax.f32 %v2429_v13, 0.0  ;;  %v2380_v30 = vadd.f32 %v5462_v53, %v2337_v3  ;;  %v2427_v39 = vadd.f32 %v5465_v0, %v2384_v46  ;;  %v4946_v13 = vld [vmem:[#allocation6 + $0x1f0] ss:$8 sps:$4 sm:$0xff]   ;;  %v4951_v53 = vld [vmem:[#allocation6 + $0x1e4] ss:$8 sps:$4 sm:$0xff]  }
 0x1cc   :  { %v4954_v0 = vld [vmem:[#allocation6 + $0x1d4] ss:$8 sps:$4 sm:$0xff]  }
 0x1cd   :  { %3283 = vmatpush1.bf16.msra.mxu0 %v4883_v14  ;;  %v2778_v8 = vpack.c.bf16 %v2773_v18, %v2768_v17  ;;  %v2423_v25 = vadd.f32 %v5458_v50, %v2380_v30  ;;  %v2772_v14 = vmax.f32 %v2427_v39, 0.0  ;;  %v4952_v18 = vld [vmem:[#allocation6 + $0x1d0] ss:$8 sps:$4 sm:$0xff]   ;;  %v4957_v50 = vld [vmem:[#allocation6 + $0x1c4] ss:$8 sps:$4 sm:$0xff]  }
 0x1ce   :  { %2753 = vmatpush2.bf16.msra.mxu1 %v4886_v15  ;;  %3284 = vmatprep.subr.bf16.mxu0 %v4889_v16  ;;  %v4949_v16 = vld [vmem:[#allocation6 + $0x1e0] ss:$8 sps:$4 sm:$0xff]  }
 0x1cf   :  { %2754 = vmatprep.subr.bf16.mxu1 %v5254_v12  ;;  %3306 = vmatprep.mubr.bf16.mxu0 %v2778_v8  ;;  %v2767_v15 = vmax.f32 %v2423_v25, 0.0  ;;  %v4955_v8 = vld [vmem:[#allocation6 + $0x1c0] ss:$8 sps:$4 sm:$0xff]  }
 0x1d1   :  { %3285 = vmatpush1.bf16.msra.mxu0 %v4887_v9  ;;  %v2777_v17 = vpack.c.bf16 %v2772_v14, %v2767_v15  ;;  %v4972_v9 = vld [vmem:[#allocation6 + $0x274] ss:$8 sps:$4 sm:$0xff]  }
 0x1d2   :  { %2755 = vmatpush2.bf16.msra.mxu1 %v4890_v20  ;;  %3286 = vmatprep.subr.bf16.mxu0 %v4893_v40  ;;  %v4960_v20 = vld [vmem:[#allocation6 + $0x1b4] ss:$8 sps:$4 sm:$0xff]   ;;  %v4970_v40 = vld [vmem:[#allocation6 + $0x270] ss:$8 sps:$4 sm:$0xff]  }
 0x1d3   :  { %2756 = vmatprep.subr.bf16.mxu1 %v5254_v12 }
 0x1d5   :  { %3287 = vmatpush1.bf16.msra.mxu0 %v4891_v21  ;;  %v4975_v21 = vld [vmem:[#allocation6 + $0x264] ss:$8 sps:$4 sm:$0xff]  }
 0x1d6   :  { %2757 = vmatpush2.bf16.msra.mxu1 %v4894_v35  ;;  %3288 = vmatprep.subr.bf16.mxu0 %v4897_v22  ;;  %v4973_v35 = vld [vmem:[#allocation6 + $0x260] ss:$8 sps:$4 sm:$0xff]   ;;  %v4958_v22 = vld [vmem:[#allocation6 + $0x1b0] ss:$8 sps:$4 sm:$0xff]  }
 0x1d7   :  { %3317 = vmatprep.subr.bf16.mxu1 %v4924_v24  ;;  %v4978_v24 = vld [vmem:[#allocation6 + $0x254] ss:$8 sps:$4 sm:$0xff]  }
 0x1d9   :  { %2759 = vmatmul.mubr.bf16.vlgmr.msra.gmra.mxu1 %v5406_v19  ;;  %3289 = vmatpush1.bf16.msra.mxu0 %v4895_v26  ;;  %v4931_v19 = vld [vmem:[#allocation6 + $0x140] ss:$8 sps:$4 sm:$0xff]   ;;  %v4963_v26 = vld [vmem:[#allocation6 + $0x1a4] ss:$8 sps:$4 sm:$0xff]  }
 0x1da   :  { %3318 = vmatpush1.bf16.msra.mxu1 %v4922_v27  ;;  %3290 = vmatprep.subr.bf16.mxu0 %v4900_v28  ;;  %v4961_v27 = vld [vmem:[#allocation6 + $0x1a0] ss:$8 sps:$4 sm:$0xff]   ;;  %v4981_v28 = vld [vmem:[#allocation6 + $0x244] ss:$8 sps:$4 sm:$0xff]  }
 0x1db   :  { %3319 = vmatprep.subr.bf16.mxu1 %v4927_v29  ;;  %v4966_v29 = vld [vmem:[#allocation6 + $0x194] ss:$8 sps:$4 sm:$0xff]  }
 0x1dd   :  { %3291 = vmatpush2.bf16.msra.mxu0 %v4898_v31  ;;  %v4979_v31 = vld [vmem:[#allocation6 + $0x240] ss:$8 sps:$4 sm:$0xff]  }
 0x1de   :  { %3320 = vmatpush1.bf16.msra.mxu1 %v4925_v32  ;;  %3292 = vmatprep.subr.bf16.mxu0 %v4903_v36  ;;  %v4964_v32 = vld [vmem:[#allocation6 + $0x190] ss:$8 sps:$4 sm:$0xff]   ;;  %v4984_v36 = vld [vmem:[#allocation6 + $0x234] ss:$8 sps:$4 sm:$0xff]  }
 0x1df   :  { %3321 = vmatprep.subr.bf16.mxu1 %v4930_v37  ;;  %v4969_v37 = vld [vmem:[#allocation6 + $0x184] ss:$8 sps:$4 sm:$0xff]  }
 0x1e1   :  { %3293 = vmatpush2.bf16.msra.mxu0 %v4901_v38  ;;  %v4982_v38 = vld [vmem:[#allocation6 + $0x230] ss:$8 sps:$4 sm:$0xff]  }
 0x1e2   :  { %3322 = vmatpush1.bf16.msra.mxu1 %v4928_v41  ;;  %3294 = vmatprep.subr.bf16.mxu0 %v4906_v42  ;;  %v4967_v41 = vld [vmem:[#allocation6 + $0x180] ss:$8 sps:$4 sm:$0xff]   ;;  %v4987_v42 = vld [vmem:[#allocation6 + $0x224] ss:$8 sps:$4 sm:$0xff]  }
 0x1e3   :  { %3323 = vmatprep.subr.bf16.mxu1 %v4933_v44  ;;  %v4985_v44 = vld [vmem:[#allocation6 + $0x220] ss:$8 sps:$4 sm:$0xff]  }
 0x1e5   :  { %3295 = vmatpush2.bf16.msra.mxu0 %v4904_v45  ;;  %v4990_v45 = vld [vmem:[#allocation6 + $0x214] ss:$8 sps:$4 sm:$0xff]  }
 0x1e6   :  { %3324 = vmatpush1.bf16.msra.mxu1 %v4931_v19  ;;  %3296 = vmatprep.subr.bf16.mxu0 %v4909_v48  ;;  %v4988_v19 = vld [vmem:[#allocation6 + $0x210] ss:$8 sps:$4 sm:$0xff]   ;;  %v4993_v48 = vld [vmem:[#allocation6 + $0x204] ss:$8 sps:$4 sm:$0xff]  }
 0x1e7   :  { %3325 = vmatprep.subr.bf16.mxu1 %v4936_v49  ;;  %v4991_v49 = vld [vmem:[#allocation6 + $0x200] ss:$8 sps:$4 sm:$0xff]  }
 0x1e9   :  { %3297 = vmatpush2.bf16.msra.mxu0 %v4907_v51 }
 0x1ea   :  { %3326 = vmatpush1.bf16.msra.mxu1 %v4934_v52  ;;  %3298 = vmatprep.subr.bf16.mxu0 %v4912_v56 }
 0x1eb   :  { %3327 = vmatprep.subr.bf16.mxu1 %v4939_v57 }
 0x1ed   :  { %3299 = vmatpush2.bf16.msra.mxu0 %v4910_v54  ;;  %v561_v54 = vrot.slane %v5449_v43, %v560_v55 }
 0x1ee   :  { %3328 = vmatpush1.bf16.msra.mxu1 %v4937_v59  ;;  %3300 = vmatprep.subr.bf16.mxu0 %v4915_v61  ;;  %v565_v61 = vrot.slane %v5449_v43, %v564_v58  ;;  %v4997_v58 = vld [vmem:[#allocation9 + $0x30] sm:$0xff]  }
 0x1ef   :  { %3329 = vmatprep.subr.bf16.mxu1 %v4942_v23 }
 0x1f1   :  { %3301 = vmatpush2.bf16.msra.mxu0 %v4913_v63 }
 0x1f2   :  { %3330 = vmatpush1.bf16.msra.mxu1 %v4940_v2  ;;  %3302 = vmatprep.subr.bf16.mxu0 %v4918_v4 }
 0x1f3   :  { %3331 = vmatprep.subr.bf16.mxu1 %v4945_v5 }
 0x1f5   :  { %3303 = vmatpush2.bf16.msra.mxu0 %v4916_v6 }
 0x1f6   :  { %3332 = vmatpush1.bf16.msra.mxu1 %v4943_v7  ;;  %3304 = vmatprep.subr.bf16.mxu0 %v4921_v10 }
 0x1f7   :  { %3333 = vmatprep.subr.bf16.mxu1 %v4948_v11 }
 0x1f9   :  { %3305 = vmatpush2.bf16.msra.mxu0 %v4919_v1 }
 0x1fa   :  { %3334 = vmatpush2.bf16.msra.mxu1 %v4946_v13  ;;  %3360 = vmatprep.subr.bf16.mxu0 %v4972_v9 }
 0x1fb   :  { %3335 = vmatprep.subr.bf16.mxu1 %v4951_v53 }
 0x1fc   :  { %3307 = vmatmul.mubr.bf16.vlgmr.msra.gmra.mxu0 %v2777_v17 }
 0x1fd   :  { %3392 = vmatprep.mubr.bf16.mxu0 %v5254_v12  ;;  %3361 = vmatpush1.bf16.msra.mxu0 %v4970_v40  ;;  %v4976_v12 = vld [vmem:[#allocation6 + $0x250] ss:$8 sps:$4 sm:$0xff]   ;;  %v2465_v51 = vpop.f32.mrf.mxu1 }
 0x1fe   :  { %3336 = vmatpush2.bf16.msra.mxu1 %v4949_v16  ;;  %3362 = vmatprep.subr.bf16.mxu0 %v4975_v21  ;;  %v2466_v23 = vadd.f32 %v2465_v51, %v561_v54 }
 0x1ff   :  { %3337 = vmatprep.subr.bf16.mxu1 %v4954_v0  ;;  %v2467_v56 = vpop.f32.mrf.mxu1 }
 0x200   :  { %v2508_v52 = vpop.f32.mrf.mxu0  ;;  %v2468_v2 = vadd.f32 %v2467_v56, %v565_v61 }
 0x201   :  { %3363 = vmatpush1.bf16.msra.mxu0 %v4973_v35  ;;  %v2469_v59 = vpop.f32.mrf.mxu1  ;;  %v2509_v30 = vadd.f32 %v2508_v52, %v2466_v23 }
 0x202   :  { %3338 = vmatpush2.bf16.msra.mxu1 %v4952_v18  ;;  %3364 = vmatprep.subr.bf16.mxu0 %v4978_v24  ;;  %v2510_v57 = vpop.f32.mrf.mxu0  ;;  %v2470_v4 = vadd.f32 %v2469_v59, %v561_v54 }
 0x203   :  { %3339 = vmatprep.subr.bf16.mxu1 %v4957_v50  ;;  %v2471_v62 = vpop.f32.mrf.mxu1  ;;  %v2511_v5 = vadd.f32 %v2510_v57, %v2468_v2  ;;  %v4999_v2 = vld [vmem:[#allocation9 + $0x28] sm:$0xff]  }
 0x204   :  { %v2512_v60 = vpop.f32.mrf.mxu0  ;;  %v2472_v39 = vadd.f32 %v2471_v62, %v565_v61 }
 0x205   :  { %3365 = vmatpush1.bf16.msra.mxu0 %v4976_v12  ;;  %v2513_v10 = vadd.f32 %v2512_v60, %v2470_v4  ;;  %v5000_v4 = vld [vmem:[#allocation9 + $0x60] sm:$0xff]  }
 0x206   :  { %3340 = vmatpush2.bf16.msra.mxu1 %v4955_v8  ;;  %3366 = vmatprep.subr.bf16.mxu0 %v4981_v28  ;;  %v2514_v63 = vpop.f32.mrf.mxu0 }
 0x207   :  { %3341 = vmatprep.subr.bf16.mxu1 %v4960_v20  ;;  %v2515_v14 = vadd.f32 %v2514_v63, %v2472_v39 }
 0x209   :  { %3367 = vmatpush1.bf16.msra.mxu0 %v4979_v31  ;;  %v568_v31 = vsub.s32 4, %v5443_v33 }
 0x20a   :  { %3342 = vmatpush2.bf16.msra.mxu1 %v4958_v22  ;;  %3368 = vmatprep.subr.bf16.mxu0 %v4984_v36 }
 0x20b   :  { %3343 = vmatprep.subr.bf16.mxu1 %v4963_v26 }
 0x20d   :  { %3369 = vmatpush1.bf16.msra.mxu0 %v4982_v38 }
 0x20e   :  { %3344 = vmatpush2.bf16.msra.mxu1 %v4961_v27  ;;  %3370 = vmatprep.subr.bf16.mxu0 %v4987_v42 }
 0x20f   :  { %3345 = vmatprep.subr.bf16.mxu1 %v4966_v29 }
 0x211   :  { %3371 = vmatpush1.bf16.msra.mxu0 %v4985_v44 }
 0x212   :  { %3346 = vmatpush2.bf16.msra.mxu1 %v4964_v32  ;;  %3372 = vmatprep.subr.bf16.mxu0 %v4990_v45 }
 0x213   :  { %3347 = vmatprep.subr.bf16.mxu1 %v4969_v37  ;;  %v569_v37 = vrot.slane %v5449_v43, %v568_v31  ;;  %v4998_v43 = vld [vmem:[#allocation9 + $0x68] sm:$0xff]  }
 0x215   :  { %3373 = vmatpush1.bf16.msra.mxu0 %v4988_v19  ;;  %v4994_v19 = vld [vmem:[#allocation9 + $0x78] sm:$0xff]  }
 0x216   :  { %3348 = vmatpush2.bf16.msra.mxu1 %v4967_v41  ;;  %3374 = vmatprep.subr.bf16.mxu0 %v4993_v48  ;;  %v4995_v48 = vld [vmem:[#allocation9 + $0x38] sm:$0xff]  }
 0x217   :  { %4336 = vmatprep.subr.bf16.mxu1 %v4994_v19 }
 0x219   :  { %3375 = vmatpush1.bf16.msra.mxu0 %v4991_v49  ;;  %v4996_v49 = vld [vmem:[#allocation9 + $0x70] sm:$0xff]  }
 0x23c   :  { %v2594_v46 = vpop.f32.mrf.mxu0 }
 0x23d   :  { %v2551_v3 = vpop.f32.mrf.mxu1 }
 0x23e   :  { %v2596_v7 = vpop.f32.mrf.mxu0  ;;  %v2552_v25 = vadd.f32 %v2551_v3, %v2509_v30 }
 0x23f   :  { %v2553_v6 = vpop.f32.mrf.mxu1 }
 0x240   :  { %v2554_v11 = vadd.f32 %v2553_v6, %v2511_v5  ;;  %v2598_v13 = vpop.f32.mrf.mxu0  ;;  %v2595_v50 = vadd.f32 %v2594_v46, %v2552_v25 }
 0x241   :  { %v2555_v1 = vpop.f32.mrf.mxu1 }
 0x242   :  { %v2556_v53 = vadd.f32 %v2555_v1, %v2513_v10  ;;  %v2600_v16 = vpop.f32.mrf.mxu0  ;;  %v2597_v17 = vadd.f32 %v2596_v7, %v2554_v11  ;;  %v2769_v21 = vmax.f32 %v2595_v50, 0.0  ;;  %v5001_v7 = vld [vmem:[#allocation9 + $0x20] sm:$0xff]   ;;  %v5002_v11 = vld [vmem:[#allocation9 + $0x58] sm:$0xff]  }
 0x243   :  { %v2557_v15 = vpop.f32.mrf.mxu1  ;;  %v5003_v1 = vld [vmem:[#allocation9 + $0x18] sm:$0xff]  }
 0x244   :  { %v2558_v0 = vadd.f32 %v2557_v15, %v2515_v14  ;;  %v2599_v18 = vadd.f32 %v2598_v13, %v2556_v53  ;;  %v2770_v20 = vmax.f32 %v2597_v17, 0.0  ;;  %v5004_v13 = vld [vmem:[#allocation9 + $0x50] sm:$0xff]   ;;  %v5006_v53 = vld [vmem:[#allocation9 + $0x48] sm:$0xff]   ;;  %v5009_v17 = vld [vmem:[#allocation9] sm:$0xff]  }
 0x245   :  { %v5005_v14 = vld [vmem:[#allocation9 + $0x10] sm:$0xff]   ;;  %v5007_v15 = vld [vmem:[#allocation9 + $0x8] sm:$0xff]  }
 0x246   :  { %v2601_v8 = vadd.f32 %v2600_v16, %v2558_v0  ;;  %v2774_v9 = vmax.f32 %v2599_v18, 0.0  ;;  %v5008_v16 = vld [vmem:[#allocation9 + $0x40] sm:$0xff]   ;;  %v5255_v18 = vmov 0.0   ;;  %v5011_v50 = vld [vmem:[#allocation12 + $0x30] sm:$0xff]  }
 0x247   :  { %v5010_v0 = vld [vmem:[#allocation12 + $0x38] sm:$0xff]   ;;  %4376 = vmatprep.subr.bf16.mxu0 %v5255_v18 }
 0x248   :  { %v2775_v40 = vmax.f32 %v2601_v8, 0.0  ;;  %v2779_v22 = vpack.c.bf16 %v2774_v9, %v2769_v21  ;;  %v5012_v8 = vld [vmem:[#allocation12 + $0x28] sm:$0xff]   ;;  %v5013_v9 = vld [vmem:[#allocation12 + $0x20] sm:$0xff]  }
 0x24a   :  { %v2780_v35 = vpack.c.bf16 %v2775_v40, %v2770_v20 }
 0x24c   :  { %3349 = vmatprep.mubr.bf16.mxu1 %v2780_v35 }
 0x24d   :  { %3350 = vmatmul.mubr.bf16.vlgmr.msra.gmra.mxu1 %v2779_v22 }
 0x24e   :  { %4337 = vmatpush3.bf16.msra.mxu1 %v4995_v48 }
 0x24f   :  { %4338 = vmatprep.subr.bf16.mxu1 %v4996_v49 }
 0x252   :  { %4339 = vmatpush3.bf16.msra.mxu1 %v4997_v58 }
 0x253   :  { %4340 = vmatprep.subr.bf16.mxu1 %v4998_v43  ;;  %v5016_v43 = vld [vmem:[#allocation12 + $0x8] sm:$0xff]  }
 0x256   :  { %4341 = vmatpush3.bf16.msra.mxu1 %v4999_v2  ;;  %v5021_v2 = vld [vmem:[#allocation15 + $0x20] sm:$0xff]  }
 0x257   :  { %4342 = vmatprep.subr.bf16.mxu1 %v5000_v4 }
 0x25a   :  { %4343 = vmatpush3.bf16.msra.mxu1 %v5001_v7 }
 0x25b   :  { %4344 = vmatprep.subr.bf16.mxu1 %v5002_v11 }
 0x25c   :  { %v4286_v24 = vpop.f32.mrf.mxu0 }
 0x25d   :  { %v4308_v28 = vpop.f32.mrf.mxu1 }
 0x25e   :  { %v4287_v26 = vpop.f32.mrf.mxu0  ;;  %4345 = vmatpush3.bf16.msra.mxu1 %v5003_v1 }
 0x25f   :  { %v4309_v32 = vpop.f32.mrf.mxu1  ;;  %v4288_v38 = vadd.f32 %v4287_v26, %v4286_v24  ;;  %4346 = vmatprep.subr.bf16.mxu1 %v5004_v13  ;;  %v2862_v24 = vld [vmem:[#allocation7] sm:$0x3] }
 0x260   :  { %v4289_v12 = vpop.f32.mrf.mxu0  ;;  %v4310_v55 = vadd.f32 %v4309_v32, %v4308_v28  ;;  %v2871_v26 = vrot.slane %v2862_v24, %v556_v34 }
 0x261   :  { %v4311_v41 = vpop.f32.mrf.mxu1  ;;  %v2638_v45 = vadd.f32 %v4288_v38, %v569_v37 }
 0x262   :  { %v4290_v27 = vpop.f32.mrf.mxu0  ;;  %4347 = vmatpush3.bf16.msra.mxu1 %v5005_v14  ;;  %v5023_v14 = vld [vmem:[#allocation15 + $0x10] sm:$0xff]  }
 0x263   :  { %v4291_v44 = vadd.f32 %v4290_v27, %v4289_v12  ;;  %v4312_v51 = vpop.f32.mrf.mxu1  ;;  %v2679_v54 = vadd.f32 %v4310_v55, %v2638_v45  ;;  %4348 = vmatprep.subr.bf16.mxu1 %v5006_v53  ;;  %v2867_v12 = vrot.slane %v2862_v24, %v552_v47  ;;  %v5024_v53 = vld [vmem:[#allocation15 + $0x8] sm:$0xff]  }
 0x264   :  { %v4313_v59 = vadd.f32 %v4312_v51, %v4311_v41 }
 0x265   :  { %v2641_v56 = vadd.f32 %v4291_v44, %v569_v37 }
 0x266   :  { %4349 = vmatpush3.bf16.msra.mxu1 %v5007_v15  ;;  %v5025_v15 = vld [vmem:[#allocation15] sm:$0xff]  }
 0x267   :  { %v2682_v23 = vadd.f32 %v4313_v59, %v2641_v56  ;;  %4350 = vmatprep.subr.bf16.mxu1 %v5008_v16  ;;  %v5014_v59 = vld [vmem:[#allocation12 + $0x18] sm:$0xff]   ;;  %v4252_v16 = vld [vmem:[#allocation13] ss:$0 sm:$0xff] }
 0x26a   :  { %4351 = vmatpush3.bf16.msra.mxu1 %v5009_v17 }
 0x26b   :  { %4396 = vmatprep.subr.bf16.mxu1 %v5255_v18 }
 0x27c   :  { %v4330_v29 = vpop.f32.mrf.mxu0 }
 0x27e   :  { %v4331_v36 = vpop.f32.mrf.mxu0 }
 0x27f   :  { %v4332_v57 = vadd.f32 %v4331_v36, %v4330_v29 }
 0x280   :  { %v4333_v42 = vpop.f32.mrf.mxu0 }
 0x281   :  { %v2720_v62 = vadd.f32 %v4332_v57, %v2679_v54 }
 0x282   :  { %v4334_v52 = vpop.f32.mrf.mxu0 }
 0x283   :  { %v4335_v60 = vadd.f32 %v4334_v52, %v4333_v42 }
 0x285   :  { %v2723_v46 = vadd.f32 %v4335_v60, %v2682_v23  ;;  %v5015_v60 = vld [vmem:[#allocation12 + $0x10] sm:$0xff]   ;;  %v5018_v23 = vld [vmem:[#allocation15 + $0x38] sm:$0xff]  }
 0x299   :  { %v2760_v61 = vpop.f32.mrf.mxu1 }
 0x29a   :  { %v2761_v3 = vadd.f32 %v2760_v61, %v2720_v62  ;;  %v5017_v61 = vld [vmem:[#allocation12] sm:$0xff]   ;;  %v5019_v62 = vld [vmem:[#allocation15 + $0x30] sm:$0xff]  }
 0x29b   :  { %v2762_v63 = vpop.f32.mrf.mxu1 }
 0x29c   :  { %v2771_v39 = vmax.f32 %v2761_v3, 0.0  ;;  %v5020_v63 = vld [vmem:[#allocation15 + $0x28] sm:$0xff]   ;;  %v5022_v3 = vld [vmem:[#allocation15 + $0x18] sm:$0xff]  }
 0x29d   :  { %v2763_v5 = vpop.f32.mrf.mxu1 }
 0x29e   :  { %v2764_v30 = vadd.f32 %v2763_v5, %v2723_v46 }
 0x29f   :  { %v2765_v6 = vpop.f32.mrf.mxu1 }
 0x2a0   :  { %v2776_v10 = vmax.f32 %v2764_v30, 0.0  ;;  %v4235_v30 = vld [vmem:[#allocation10] ss:$0 sm:$0xff] }
 0x2a2   :  { %v2781_v25 = vpack.c.bf16 %v2776_v10, %v2771_v39 }
 0x2a4   :  { %3393 = vmatmul.mubr.bf16.vlgmr.msra.gmra.mxu0 %v2781_v25 }
 0x2a5   :  { %4377 = vmatpush3.bf16.msra.mxu0 %v5010_v0  ;;  %4392 = vmatprep.mubr.msk.bf16.mxu0 %vm5256_vm2, %v5255_v18 }
 0x2a6   :  { %4378 = vmatprep.subr.bf16.mxu0 %v5255_v18 }
 0x2a9   :  { %4379 = vmatpush3.bf16.msra.mxu0 %v5011_v50 }
 0x2aa   :  { %4380 = vmatprep.subr.bf16.mxu0 %v5255_v18 }
 0x2ad   :  { %4381 = vmatpush3.bf16.msra.mxu0 %v5012_v8 }
 0x2ae   :  { %4382 = vmatprep.subr.bf16.mxu0 %v5255_v18 }
 0x2b1   :  { %4383 = vmatpush3.bf16.msra.mxu0 %v5013_v9 }
 0x2b2   :  { %4384 = vmatprep.subr.bf16.mxu0 %v5255_v18 }
 0x2b5   :  { %4385 = vmatpush3.bf16.msra.mxu0 %v5014_v59 }
 0x2b6   :  { %4386 = vmatprep.subr.bf16.mxu0 %v5255_v18 }
 0x2b9   :  { %4387 = vmatpush3.bf16.msra.mxu0 %v5015_v60 }
 0x2ba   :  { %4388 = vmatprep.subr.bf16.mxu0 %v5255_v18 }
 0x2bc   :  { %v3308_v20 = vpop.f32.mrf.mxu0 }
 0x2bd   :  { %v3309_v36 = vadd.f32 %v3308_v20, %v2867_v12  ;;  %4389 = vmatpush3.bf16.msra.mxu0 %v5016_v43 }
 0x2be   :  { %v3310_v40 = vpop.f32.mrf.mxu0  ;;  %4390 = vmatprep.subr.bf16.mxu0 %v5255_v18 }
 0x2bf   :  { %v3311_v31 = vadd.f32 %v3310_v40, %v2871_v26 }
 0x2c0   :  { %v3312_v35 = vpop.f32.mrf.mxu0 }
 0x2c1   :  { %v3313_v32 = vadd.f32 %v3312_v35, %v2867_v12  ;;  %4391 = vmatpush3.bf16.msra.mxu0 %v5017_v61 }
 0x2c2   :  { %v3314_v27 = vpop.f32.mrf.mxu0 }
 0x2c3   :  { %v3315_v41 = vadd.f32 %v3314_v27, %v2871_v26 }
 0x30d   :  { %v3351_v21 = vpop.f32.mrf.mxu1 }
 0x30e   :  { %v3352_v45 = vadd.f32 %v3351_v21, %v3309_v36 }
 0x30f   :  { %v3353_v22 = vpop.f32.mrf.mxu1 }
 0x310   :  { %v3354_v42 = vadd.f32 %v3353_v22, %v3311_v31  ;;  %v4261_v22 = vld [vmem:[#allocation16] ss:$0 sm:$0xff] }
 0x311   :  { %v3355_v28 = vpop.f32.mrf.mxu1 }
 0x312   :  { %v3356_v44 = vadd.f32 %v3355_v28, %v3313_v32 }
 0x313   :  { %v3357_v37 = vpop.f32.mrf.mxu1 }
 0x314   :  { %v3358_v48 = vadd.f32 %v3357_v37, %v3315_v41 }
 0x364   :  { %v3394_v29 = vpop.f32.mrf.mxu0 }
 0x365   :  { %v3395_v34 = vadd.f32 %v3394_v29, %v3352_v45 }
 0x366   :  { %v3396_v38 = vpop.f32.mrf.mxu0 }
 0x367   :  { %v3397_v49 = vadd.f32 %v3396_v38, %v3354_v42  ;;  %v3403_v57 = vmax.f32 %v3395_v34, 0.0 }
 0x368   :  { %v3398_v19 = vpop.f32.mrf.mxu0 }
 0x369   :  { %v3399_v51 = vadd.f32 %v3398_v19, %v3356_v44  ;;  %v3404_v55 = vmax.f32 %v3397_v49, 0.0 }
 0x36a   :  { %v3400_v52 = vpop.f32.mrf.mxu0 }
 0x36b   :  { %v3401_v33 = vadd.f32 %v3400_v52, %v3358_v48  ;;  %v3405_v47 = vmax.f32 %v3399_v51, 0.0 }
 0x36d   :  { %v3406_v56 = vmax.f32 %v3401_v33, 0.0  ;;  %v3407_v54 = vpack.c.bf16 %v3405_v47, %v3403_v57 }
 0x36f   :  { %v3408_v58 = vpack.c.bf16 %v3406_v56, %v3404_v55 }
 0x371   :  { %3576 = vmatprep.mubr.bf16.mxu1 %v3408_v58 }
 0x372   :  { %3577 = vmatmul.mubr.bf16.vlgmr.msra.gmra.mxu1 %v3407_v54 }
 0x373   :  { %4412 = vmatprep.mubr.msk.bf16.mxu1 %vm5256_vm2, %v5255_v18  ;;  %4397 = vmatpush3.bf16.msra.mxu1 %v5018_v23 }
 0x374   :  { %4398 = vmatprep.subr.bf16.mxu1 %v5255_v18 }
 0x377   :  { %4399 = vmatpush3.bf16.msra.mxu1 %v5019_v62 }
 0x378   :  { %4400 = vmatprep.subr.bf16.mxu1 %v5255_v18 }
 0x37b   :  { %4401 = vmatpush3.bf16.msra.mxu1 %v5020_v63 }
 0x37c   :  { %4402 = vmatprep.subr.bf16.mxu1 %v5255_v18 }
 0x37f   :  { %4403 = vmatpush3.bf16.msra.mxu1 %v5021_v2 }
 0x380   :  { %4404 = vmatprep.subr.bf16.mxu1 %v5255_v18 }
 0x383   :  { %4405 = vmatpush3.bf16.msra.mxu1 %v5022_v3 }
 0x384   :  { %4406 = vmatprep.subr.bf16.mxu1 %v5255_v18 }
 0x387   :  { %4407 = vmatpush3.bf16.msra.mxu1 %v5023_v14 }
 0x388   :  { %4408 = vmatprep.subr.bf16.mxu1 %v5255_v18 }
 0x38b   :  { %4409 = vmatpush3.bf16.msra.mxu1 %v5024_v53 }
 0x38c   :  { %4410 = vmatprep.subr.bf16.mxu1 %v5255_v18 }
 0x38f   :  { %4411 = vmatpush3.bf16.msra.mxu1 %v5025_v15 }
 0x432   :  { %v4352_v46 = vpop.f32.mrf.mxu1 }
 0x434   :  { %v4353_v4 = vpop.f32.mrf.mxu1 }
 0x435   :  { %v4354_v5 = vadd.f32 %v4353_v4, %v4352_v46 }
 0x436   :  { %v4355_v6 = vpop.f32.mrf.mxu1 }
 0x437   :  { %v3579_v39 = vadd.f32 %v4354_v5, %v4235_v30 }
 0x438   :  { %v4356_v7 = vpop.f32.mrf.mxu1 }
 0x439   :  { %v4357_v10 = vadd.f32 %v4356_v7, %v4355_v6  ;;  %v3585_v25 = vmax.f32 %v3579_v39, 0.0 }
 0x43b   :  { %v3582_v11 = vadd.f32 %v4357_v10, %v4235_v30 }
 0x43d   :  { %v3586_v1 = vmax.f32 %v3582_v11, 0.0 }
 0x43f   :  { %v3587_v13 = vpack.c.bf16 %v3586_v1, %v3585_v25 }
 0x441   :  { %4393 = vmatmul.mubr.bf16.vlgmr.msra.gmra.mxu0 %v3587_v13 }
 0x501   :  { %v3693_v17 = vpop.f32.mrf.mxu0 }
 0x502   :  { %v3694_v50 = vadd.f32 %v4252_v16, %v3693_v17 }
 0x503   :  { %v4394_v0 = vpop.f32.mrf.mxu0 }
 0x504   :  { %v3700_v40 = vmax.f32 %v3694_v50, 0.0 }
 0x505   :  { %v3696_v8 = vpop.f32.mrf.mxu0 }
 0x506   :  { %v3697_v9 = vadd.f32 %v4252_v16, %v3696_v8 }
 0x507   :  { %v4395_v20 = vpop.f32.mrf.mxu0 }
 0x508   :  { %v3701_v21 = vmax.f32 %v3697_v9, 0.0 }
 0x50a   :  { %v3702_v35 = vpack.c.bf16 %v3701_v21, %v3700_v40 }
 0x50c   :  { %4413 = vmatmul.mubr.bf16.vlgmr.msra.gmra.mxu1 %v3702_v35 }
 0x5cc   :  { %v3808_v24 = vpop.f32.mrf.mxu1 }
 0x5cd   :  { %v3809_v26 = vadd.f32 %v4261_v22, %v3808_v24 }
 0x5ce   :  { %v4414_v12 = vpop.f32.mrf.mxu1 }
 0x5cf   :  { %3815 = vst [vmem:[%s5532_s11] sm:$0xff] %v3809_v26 }
 0x5d0   :  { %v3811_v18 = vpop.f32.mrf.mxu1 }
 0x5d1   :  { %v3812_v27 = vadd.f32 %v4261_v22, %v3811_v18 }
 0x5d2   :  { %v4415_v28 = vpop.f32.mrf.mxu1 }
 0x5d3   :  { %3816 = vst [vmem:[%s5532_s11 + $0x8] sm:$0xff] %v3812_v27 }
 0x5d4   :  { %3821 = vsyncpa [#allocation3], 1 }
 0x5d5   :  { %3822 = vsyncpa [#allocation5], 1 }
 0x5d6   :  { %3823 = vsyncpa [#allocation8], 1 }
 0x5d7   :  { %3824 = vsyncpa [#allocation11], 1 }
 0x5d8   :  { %3825 = vsyncpa [#allocation14], 1 }
 0x5d9   :  { %3826 = vsyncpa [#allocation17], 1 }

</bundles_post_ra>
